<compile_context>
chip_gen: v6e
topology: v6e:2x2x1
jax: 0.10.0
libtpu: 0.0.40
codegen_flags: <defaults>
</compile_context>

<pallas_src>
import functools

import jax
import jax.numpy as jnp
from jax import lax
from jax.experimental import pallas as pl
from jax.experimental.pallas import tpu as pltpu


# --------------------------------------------------------------------------- #
# Kernel 1: crop_bbox_batch — per-object bilinear box crop.
# --------------------------------------------------------------------------- #
def _crop_kernel(o2i_ref, imgT_ref, wy_ref, wxt_ref, out_ref, *, channels, width):
    del o2i_ref  # only consumed by the index_maps (scalar prefetch)
    # Channel-batched row resample: (S, H) @ (H, Cin*W) -> (S, Cin*W).
    rows = jnp.dot(wy_ref[0], imgT_ref[0], preferred_element_type=jnp.float32)
    for c in range(channels):  # tiny static loop: column resample per channel
        out_ref[0, c] = jnp.dot(rows[:, c * width:(c + 1) * width], wxt_ref[0],
                                preferred_element_type=jnp.float32)


def _interp_matrix(lo, hi, out_size, in_size):
    """(O, out, in) separable bilinear sampling weights, matching
    F.grid_sample(align_corners=True, padding_mode='zeros') on the linspace
    grid that sg2im's crop_bbox builds from the box corners."""
    lo = lo.astype(jnp.float32)
    hi = hi.astype(jnp.float32)
    steps = jnp.arange(out_size, dtype=jnp.float32) / float(max(out_size - 1, 1))
    pos = (lo[:, None] + (hi - lo)[:, None] * steps[None, :]) * (in_size - 1)
    i0 = jnp.floor(pos)
    frac = pos - i0
    src = jnp.arange(in_size, dtype=jnp.float32)[None, None, :]
    w0 = (1.0 - frac)[:, :, None] * (src == i0[:, :, None]).astype(jnp.float32)
    w1 = frac[:, :, None] * (src == (i0[:, :, None] + 1.0)).astype(jnp.float32)
    return w0 + w1  # out-of-range taps automatically get weight 0


def crop_bbox_batch(imgs, boxes, obj_to_img, crop_size):
    n_img, chans, h, w = imgs.shape
    n_obj = boxes.shape[0]
    hh = ww = crop_size

    # Group objects by source image so consecutive grid steps re-use the
    # VMEM-resident image tile (Pallas skips the DMA when the block index
    # repeats).  Outputs are un-permuted below.
    order = jnp.argsort(obj_to_img)
    inv_order = jnp.argsort(order)
    boxes_s = boxes[order]
    o2i_s = obj_to_img[order].astype(jnp.int32)

    wy = _interp_matrix(boxes_s[:, 1], boxes_s[:, 3], hh, h)                 # (O,HH,H)
    wxt = jnp.transpose(_interp_matrix(boxes_s[:, 0], boxes_s[:, 2], ww, w),
                        (0, 2, 1))                                           # (O,W,WW)
    # Channel-batched image layout -> first resample is 1 matmul per object.
    imgT = jnp.transpose(imgs.astype(jnp.float32), (0, 2, 1, 3)).reshape(
        n_img, h, chans * w)

    kern = functools.partial(_crop_kernel, channels=chans, width=w)
    crops_s = pl.pallas_call(
        kern,
        out_shape=jax.ShapeDtypeStruct((n_obj, chans, hh, ww), jnp.float32),
        grid_spec=pltpu.PrefetchScalarGridSpec(
            num_scalar_prefetch=1,
            grid=(n_obj,),
            in_specs=[
                # data-dependent fetch: DMA only imgs[obj_to_img[o]]
                pl.BlockSpec((1, h, chans * w), lambda o, o2i: (o2i[o], 0, 0)),
                pl.BlockSpec((1, hh, h), lambda o, o2i: (o, 0, 0)),
                pl.BlockSpec((1, w, ww), lambda o, o2i: (o, 0, 0)),
            ],
            out_specs=pl.BlockSpec((1, chans, hh, ww),
                                   lambda o, o2i: (o, 0, 0, 0)),
        ),
        compiler_params=pltpu.CompilerParams(
            dimension_semantics=("parallel",)),  # objects independent (v7x 2 TCs)
    )(o2i_s, imgT, wy, wxt)
    # TODO(synk): process a block of objects per grid step to amortize the
    # ~0.35us per-step overhead once object counts get large.
    return crops_s[inv_order]


# --------------------------------------------------------------------------- #
# Kernel 2: the whole discriminator (conv1 -> ReLU -> conv2+GAP -> FC ->
#           real/id heads -> per-object cross-entropy) in one pallas_call,
#           tiled over blocks of objects.
# --------------------------------------------------------------------------- #
def _disc_kernel(x27_ref, w1_ref, b1_ref, maskT_ref, w2e_ref, b2_ref,
                 wfc_ref, bfc_ref, whead_ref, bhead_ref, onehot_ref,
                 out_ref, *, bo, p_spatial, num_id, inv_pool):
    # ---- conv1 (3x3, stride 2, 'same'): ONE (C1, 27) x (27, BO*P) matmul,
    # output kept transposed so the big M axis is lane-dense.
    y1 = jnp.dot(w1_ref[...], x27_ref[...], preferred_element_type=jnp.float32)
    y1 = jnp.maximum(y1 + b1_ref[...], 0.0).astype(jnp.bfloat16)   # (C1, BO*P)

    # ---- conv2 (3x3 s2 'same') fused with GlobalAvgPool.  conv2 is linear, so
    # GAP commutes: per object, a (C1, P) @ (P, 9) spatial reduction against the
    # O-independent per-tap mask, then an f32 channel mix with w2 (no conv2
    # spatial output is ever materialized, no O x O mask).
    cols = []
    for ow in range(bo):                                   # static, bo <= ~8
        y1_o = y1[:, ow * p_spatial:(ow + 1) * p_spatial]  # (C1, P)
        u_o = jnp.dot(y1_o, maskT_ref[...],
                      preferred_element_type=jnp.float32)  # (C1, 9)
        prod = w2e_ref[...] * u_o[None]                    # (C2, C1, 9), f32
        cols.append(jnp.sum(jnp.sum(prod, axis=2), axis=1, keepdims=True))
    pooledT = jnp.concatenate(cols, axis=1) * inv_pool + b2_ref[...]   # (C2, BO)

    # ---- Linear(C2 -> hidden): (BO, hidden), hidden lane-dense. ----
    vecs = lax.dot_general(pooledT.astype(jnp.bfloat16), wfc_ref[...],
                           (((0,), (0,)), ((), ())),
                           preferred_element_type=jnp.float32) + bfc_ref[...]

    # ---- real + id heads packed into one 128-lane-padded matmul epilogue ----
    heads = jnp.dot(vecs.astype(jnp.bfloat16), whead_ref[...],
                    preferred_element_type=jnp.float32) + bhead_ref[...]   # (BO,128)
    ids = heads[:, 1:1 + num_id]
    mx = jnp.max(ids, axis=-1, keepdims=True)
    lse = jnp.log(jnp.sum(jnp.exp(ids - mx), axis=-1, keepdims=True)) + mx
    picked = jnp.sum(ids * onehot_ref[...], axis=-1, keepdims=True)
    ce = lse - picked                                                      # (BO,1)

    # Lane-dense store: col 0 = real score, cols 1..num_id = id logits,
    # col num_id+1 = per-object CE term, rest = padding.
    col = lax.broadcasted_iota(jnp.int32, heads.shape, 1)
    out_ref[...] = jnp.where(col == num_id + 1, ce, heads)


def _pick_block_objects(n_obj, p_spatial):
    """Objects per kernel-2 grid step. One block while the conv1 slab is small;
    otherwise blocks whose per-object tensors stay (8,128)-tileable."""
    if 27 * n_obj * p_spatial * 2 <= (8 << 20):     # <= 8 MiB bf16 slab
        return n_obj
    for bo in range(min(n_obj, 64), 0, -1):
        if n_obj % bo == 0 and bo % 8 == 0 and (bo * p_spatial) % 128 == 0:
            return bo
    return n_obj


# --------------------------------------------------------------------------- #
# Forward wrapper (host side does only layout prep, no real compute).
# --------------------------------------------------------------------------- #
def ac_crop_discriminator_forward(imgs, objs, boxes, obj_to_img, params, *,
                                  object_size=16, num_id=7):
    # TODO(synk): only the default small 'C3-8-2,C3-16-2' conv stack
    # (normalization='none', activation='relu', pooling='avg', padding='same')
    # is specialized into the fused kernel; other build_cnn tokens are not.
    crops = crop_bbox_batch(imgs, boxes, obj_to_img, object_size)  # (O,3,S,S)

    n_obj, cin, s, _ = crops.shape
    assert s % 4 == 0, "object_size must be divisible by 4 (two stride-2 convs)"
    assert 1 + num_id < 128
    c1 = params['w1'].shape[0]
    c2 = params['w2'].shape[0]
    hidden = params['fc_w'].shape[0]
    ho = wo = s // 2                      # conv1 output size (stride 2, 'same')
    p = ho * wo
    inv_pool = 1.0 / float((ho // 2) * (wo // 2))   # GAP over conv2's output

    # ---- conv1 input: K=27 mini-im2col, bf16, M = O*ho*wo on the lane axis.
    # TODO(synk): emit this slab (bf16) directly from the crop kernel to avoid
    # the extra XLA transpose/pad/slice passes over the crops.
    xp = jnp.pad(crops, ((0, 0), (0, 0), (1, 1), (1, 1)))
    taps = [xp[:, :, di:di + s - 1:2, dj:dj + s - 1:2]
            for di in range(3) for dj in range(3)]          # 9 x (O,Cin,ho,wo)
    x27 = jnp.stack(taps, axis=0)                           # (9,O,Cin,ho,wo)
    x27 = jnp.transpose(x27, (2, 0, 1, 3, 4))               # (Cin,9,O,ho,wo)
    x27 = x27.reshape(cin * 9, n_obj * p).astype(jnp.bfloat16)

    # ---- conv2+GAP: O-independent per-tap spatial mask (P, 9).
    oh2, ow2 = ho // 2, wo // 2
    rvecs = [jax.nn.one_hot(2 * jnp.arange(oh2) + di - 1, ho,
                            dtype=jnp.float32).sum(axis=0) for di in range(3)]
    cvecs = [jax.nn.one_hot(2 * jnp.arange(ow2) + dj - 1, wo,
                            dtype=jnp.float32).sum(axis=0) for dj in range(3)]
    mask_sp = jnp.stack([jnp.outer(rvecs[di], cvecs[dj]).reshape(-1)
                         for di in range(3) for dj in range(3)], axis=0)  # (9,P)
    maskT = jnp.transpose(mask_sp).astype(jnp.bfloat16)                   # (P,9)
    w2e = params['w2'].reshape(c2, c1, 9).astype(jnp.float32)             # f32 mix

    # ---- weights: pre-packed, bf16 for the MXU, heads padded to 128 lanes.
    w1pk = params['w1'].reshape(c1, cin * 9).astype(jnp.bfloat16)
    b1 = params['b1'].reshape(c1, 1).astype(jnp.float32)
    b2 = params['b2'].reshape(c2, 1).astype(jnp.float32)
    wfc = params['fc_w'].T.astype(jnp.bfloat16)                  # (C2, hidden)
    bfc = params['fc_b'].reshape(1, hidden).astype(jnp.float32)
    whead_core = jnp.concatenate([params['real_w'].T, params['id_w'].T], axis=1)
    whead = jnp.pad(whead_core, ((0, 0), (0, 128 - (1 + num_id)))
                    ).astype(jnp.bfloat16)                       # (hidden, 128)
    bhead = jnp.pad(jnp.concatenate([params['real_b'], params['id_b']]),
                    (0, 128 - (1 + num_id))).reshape(1, 128).astype(jnp.float32)
    onehot = jax.nn.one_hot(objs, num_id, dtype=jnp.float32)     # (O, num_id)

    bo = _pick_block_objects(n_obj, p)
    nb = n_obj // bo
    mb = bo * p

    args = [x27, w1pk, b1, maskT, w2e, b2, wfc, bfc, whead, bhead, onehot]
    in_specs = [
        pl.BlockSpec((27, mb), lambda b: (0, b)),
        pl.BlockSpec((c1, cin * 9), lambda b: (0, 0)),
        pl.BlockSpec((c1, 1), lambda b: (0, 0)),
        pl.BlockSpec((p, 9), lambda b: (0, 0)),
        pl.BlockSpec((c2, c1, 9), lambda b: (0, 0, 0)),
        pl.BlockSpec((c2, 1), lambda b: (0, 0)),
        pl.BlockSpec((c2, hidden), lambda b: (0, 0)),
        pl.BlockSpec((1, hidden), lambda b: (0, 0)),
        pl.BlockSpec((hidden, 128), lambda b: (0, 0)),
        pl.BlockSpec((1, 128), lambda b: (0, 0)),
        pl.BlockSpec((bo, num_id), lambda b: (b, 0)),
    ]
    out_spec = pl.BlockSpec((bo, 128), lambda b: (b, 0))

    # Cost estimate / VMEM budget recomputed from the new (O-independent) sizes.
    flops = 2 * nb * (c1 * 27 * mb                         # conv1
                      + bo * (c1 * p * 9 + c2 * c1 * 9)    # conv2 + GAP
                      + bo * c2 * hidden                   # FC
                      + bo * hidden * 128)                 # packed heads
    bytes_accessed = int(sum(a.size * a.dtype.itemsize for a in args)
                         + n_obj * 128 * 4)
    cost = pl.CostEstimate(flops=int(flops),
                           transcendentals=int(n_obj * (num_id + 1)),
                           bytes_accessed=bytes_accessed)
    weight_bytes = sum(a.size * a.dtype.itemsize for a in args[1:])
    block_bytes = (2 * 27 * mb * 2                 # x27 block, double-buffered
                   + 2 * (bo * 128 * 4)            # output block
                   + 2 * weight_bytes              # resident weights (conservative)
                   + c1 * mb * 6                   # y1 f32 + bf16
                   + bo * (hidden + 128) * 8       # vecs / heads
                   + (1 << 20))                    # scratch headroom
    vmem_limit = int(min(max(2 * block_bytes, 16 << 20), 48 << 20))  # v7x-safe

    kern = functools.partial(_disc_kernel, bo=bo, p_spatial=p,
                             num_id=num_id, inv_pool=inv_pool)
    heads_all = pl.pallas_call(
        kern,
        out_shape=jax.ShapeDtypeStruct((n_obj, 128), jnp.float32),
        grid_spec=pltpu.PrefetchScalarGridSpec(
            num_scalar_prefetch=0,
            grid=(nb,),
            in_specs=in_specs,
            out_specs=out_spec),
        compiler_params=pltpu.CompilerParams(
            dimension_semantics=("parallel",),
            vmem_limit_bytes=vmem_limit),
        cost_estimate=cost,
    )(*args)

    real_scores = heads_all[:, 0:1]                          # (O, 1)
    ac_loss = jnp.mean(heads_all[:, 1 + num_id])             # tiny final reduce
    return real_scores, ac_loss, crops


def init_params(key, *, cin=3, c1=8, c2=16, hidden=1024, num_id=7):
    """Deterministic PyTorch-default-style uniform(+-1/sqrt(fan_in)) init."""
    def unif(k, shape, fan_in):
        b = 1.0 / float(fan_in) ** 0.5
        return jax.random.uniform(k, shape, jnp.float32, -b, b)
    ks = jax.random.split(key, 10)
    return dict(
        w1=unif(ks[0], (c1, cin, 3, 3), cin * 9),
        b1=unif(ks[1], (c1,), cin * 9),
        w2=unif(ks[2], (c2, c1, 3, 3), c1 * 9),
        b2=unif(ks[3], (c2,), c1 * 9),
        fc_w=unif(ks[4], (hidden, c2), c2),
        fc_b=unif(ks[5], (hidden,), c2),
        real_w=unif(ks[6], (1, hidden), hidden),
        real_b=unif(ks[7], (1,), hidden),
        id_w=unif(ks[8], (num_id, hidden), hidden),
        id_b=unif(ks[9], (num_id,), hidden),
    )


# --------------------------------------------------------------------------- #
if __name__ == "__main__":
    key = jax.random.PRNGKey(0)
    k_img, k_box, k_prm = jax.random.split(key, 3)

    N_IMG, CHANS, H, W = 2, 3, 16, 16
    N_OBJ, NUM_ID, OBJ_SIZE = 4, 7, 16

    imgs = jax.random.normal(k_img, (N_IMG, CHANS, H, W), jnp.float32)
    k_b0, k_b1 = jax.random.split(k_box)
    lo = jax.random.uniform(k_b0, (N_OBJ, 2), jnp.float32, 0.0, 0.45)
    sz = jax.random.uniform(k_b1, (N_OBJ, 2), jnp.float32, 0.3, 0.5)
    boxes = jnp.concatenate([lo, lo + sz], axis=1)          # (x0, y0, x1, y1)
    obj_to_img = jnp.array([0, 0, 1, 1], jnp.int32)
    objs = jnp.array([1, 3, 0, 5], jnp.int32)

    params = init_params(k_prm, cin=CHANS, c1=8, c2=16, hidden=1024,
                         num_id=NUM_ID)

    fwd = jax.jit(functools.partial(ac_crop_discriminator_forward,
                                    params=params, object_size=OBJ_SIZE,
                                    num_id=NUM_ID))
    real_scores, ac_loss, object_crops = fwd(imgs, objs, boxes, obj_to_img)
    jax.block_until_ready((real_scores, ac_loss, object_crops))

    assert real_scores.shape == (N_OBJ, 1), real_scores.shape
    assert ac_loss.shape == (), ac_loss.shape
    assert object_crops.shape == (N_OBJ, CHANS, OBJ_SIZE, OBJ_SIZE), object_crops.shape
    assert bool(jnp.isfinite(real_scores).all()) and bool(jnp.isfinite(ac_loss))
    assert bool(jnp.isfinite(object_crops).all())
    print("KERNEL_OK")
</pallas_src>

<mosaic_0001>
module attributes {stable_mosaic.version = 11 : i64} {
  func.func @_crop_kernel(%arg0: i32, %arg1: memref<4xi32, #tpu.memory_space<smem>>, %arg2: memref<1x16x48xf32, #tpu.memory_space<vmem>>, %arg3: memref<1x16x16xf32, #tpu.memory_space<vmem>>, %arg4: memref<1x16x16xf32, #tpu.memory_space<vmem>>, %arg5: memref<1x3x16x16xf32, #tpu.memory_space<vmem>>) attributes {dimension_semantics = [#tpu.dimension_semantics<parallel>], iteration_bounds = array<i64: 4>, scalar_prefetch = 1 : i64, scratch_operands = 0 : i64, tpu.core_type = #tpu.core_type<tc>, window_params = [{transform_indices = @transform_0, window_bounds = array<i64: 1, 16, 48>}, {transform_indices = @transform_1, window_bounds = array<i64: 1, 16, 16>}, {transform_indices = @transform_2, window_bounds = array<i64: 1, 16, 16>}, {transform_indices = @transform_3, window_bounds = array<i64: 1, 3, 16, 16>}]} {
    %c0 = arith.constant 0 : index
    %c0_0 = arith.constant 0 : index
    %c0_1 = arith.constant 0 : index
    %0 = vector.load %arg3[%c0, %c0_0, %c0_1] : memref<1x16x16xf32, #tpu.memory_space<vmem>>, vector<1x16x16xf32>
    %1 = vector.shape_cast %0 : vector<1x16x16xf32> to vector<16x16xf32>
    %c0_2 = arith.constant 0 : index
    %c0_3 = arith.constant 0 : index
    %c0_4 = arith.constant 0 : index
    %2 = vector.load %arg2[%c0_2, %c0_3, %c0_4] : memref<1x16x48xf32, #tpu.memory_space<vmem>>, vector<1x16x48xf32>
    %3 = vector.shape_cast %2 : vector<1x16x48xf32> to vector<16x48xf32>
    %cst = arith.constant dense<0.000000e+00> : vector<16x48xf32>
    %4 = tpu.matmul %1, %3, %cst {dimension_numbers = #tpu.dot_dimension_numbers<[1], [0], [0], [1], [0, 0, 1, 1], [], []>} : vector<16x16xf32>, vector<16x48xf32>, vector<16x48xf32> -> vector<16x48xf32>
    %5 = vector.extract_strided_slice %4 {offsets = [0, 0], sizes = [16, 16], strides = [1, 1]} : vector<16x48xf32> to vector<16x16xf32>
    %c0_5 = arith.constant 0 : index
    %c0_6 = arith.constant 0 : index
    %c0_7 = arith.constant 0 : index
    %6 = vector.load %arg4[%c0_5, %c0_6, %c0_7] : memref<1x16x16xf32, #tpu.memory_space<vmem>>, vector<1x16x16xf32>
    %7 = vector.shape_cast %6 : vector<1x16x16xf32> to vector<16x16xf32>
    %cst_8 = arith.constant dense<0.000000e+00> : vector<16x16xf32>
    %8 = tpu.matmul %5, %7, %cst_8 {dimension_numbers = #tpu.dot_dimension_numbers<[1], [0], [0], [1], [0, 0, 1, 1], [], []>} : vector<16x16xf32>, vector<16x16xf32>, vector<16x16xf32> -> vector<16x16xf32>
    %c0_9 = arith.constant 0 : index
    %c0_10 = arith.constant 0 : index
    %c0_11 = arith.constant 0 : index
    %c0_12 = arith.constant 0 : index
    %9 = vector.load %arg5[%c0_9, %c0_10, %c0_11, %c0_12] : memref<1x3x16x16xf32, #tpu.memory_space<vmem>>, vector<1x1x16x16xf32>
    %10 = vector.shape_cast %9 : vector<1x1x16x16xf32> to vector<16x16xf32>
    %11 = vector.shape_cast %8 : vector<16x16xf32> to vector<1x1x16x16xf32>
    tpu.vector_store %arg5[%c0_9, %c0_10, %c0_11, %c0_12], %11 {strides = array<i32>} : memref<1x3x16x16xf32, #tpu.memory_space<vmem>>, vector<1x1x16x16xf32>,
    %12 = vector.extract_strided_slice %4 {offsets = [0, 16], sizes = [16, 16], strides = [1, 1]} : vector<16x48xf32> to vector<16x16xf32>
    %c0_13 = arith.constant 0 : index
    %c0_14 = arith.constant 0 : index
    %c0_15 = arith.constant 0 : index
    %13 = vector.load %arg4[%c0_13, %c0_14, %c0_15] : memref<1x16x16xf32, #tpu.memory_space<vmem>>, vector<1x16x16xf32>
    %14 = vector.shape_cast %13 : vector<1x16x16xf32> to vector<16x16xf32>
    %cst_16 = arith.constant dense<0.000000e+00> : vector<16x16xf32>
    %15 = tpu.matmul %12, %14, %cst_16 {dimension_numbers = #tpu.dot_dimension_numbers<[1], [0], [0], [1], [0, 0, 1, 1], [], []>} : vector<16x16xf32>, vector<16x16xf32>, vector<16x16xf32> -> vector<16x16xf32>
    %c0_17 = arith.constant 0 : index
    %c1 = arith.constant 1 : index
    %c0_18 = arith.constant 0 : index
    %c0_19 = arith.constant 0 : index
    %16 = vector.load %arg5[%c0_17, %c1, %c0_18, %c0_19] : memref<1x3x16x16xf32, #tpu.memory_space<vmem>>, vector<1x1x16x16xf32>
    %17 = vector.shape_cast %16 : vector<1x1x16x16xf32> to vector<16x16xf32>
    %18 = vector.shape_cast %15 : vector<16x16xf32> to vector<1x1x16x16xf32>
    tpu.vector_store %arg5[%c0_17, %c1, %c0_18, %c0_19], %18 {strides = array<i32>} : memref<1x3x16x16xf32, #tpu.memory_space<vmem>>, vector<1x1x16x16xf32>,
    %19 = vector.extract_strided_slice %4 {offsets = [0, 32], sizes = [16, 16], strides = [1, 1]} : vector<16x48xf32> to vector<16x16xf32>
    %c0_20 = arith.constant 0 : index
    %c0_21 = arith.constant 0 : index
    %c0_22 = arith.constant 0 : index
    %20 = vector.load %arg4[%c0_20, %c0_21, %c0_22] : memref<1x16x16xf32, #tpu.memory_space<vmem>>, vector<1x16x16xf32>
    %21 = vector.shape_cast %20 : vector<1x16x16xf32> to vector<16x16xf32>
    %cst_23 = arith.constant dense<0.000000e+00> : vector<16x16xf32>
    %22 = tpu.matmul %19, %21, %cst_23 {dimension_numbers = #tpu.dot_dimension_numbers<[1], [0], [0], [1], [0, 0, 1, 1], [], []>} : vector<16x16xf32>, vector<16x16xf32>, vector<16x16xf32> -> vector<16x16xf32>
    %c0_24 = arith.constant 0 : index
    %c2 = arith.constant 2 : index
    %c0_25 = arith.constant 0 : index
    %c0_26 = arith.constant 0 : index
    %23 = vector.load %arg5[%c0_24, %c2, %c0_25, %c0_26] : memref<1x3x16x16xf32, #tpu.memory_space<vmem>>, vector<1x1x16x16xf32>
    %24 = vector.shape_cast %23 : vector<1x1x16x16xf32> to vector<16x16xf32>
    %25 = vector.shape_cast %22 : vector<16x16xf32> to vector<1x1x16x16xf32>
    tpu.vector_store %arg5[%c0_24, %c2, %c0_25, %c0_26], %25 {strides = array<i32>} : memref<1x3x16x16xf32, #tpu.memory_space<vmem>>, vector<1x1x16x16xf32>,
    return
  }
  func.func @transform_0(%arg0: i32, %arg1: memref<4xi32, #tpu.memory_space<smem>>) -> (i32, i32, i32) {
    %0 = arith.index_cast %arg0 : i32 to index
    %1 = memref.load %arg1[%0] : memref<4xi32, #tpu.memory_space<smem>>
    %c0_i32 = arith.constant 0 : i32
    %c0_i32_0 = arith.constant 0 : i32
    %c0_i32_1 = arith.constant 0 : i32
    return %1, %c0_i32, %c0_i32_0 : i32, i32, i32
  }
  func.func @transform_1(%arg0: i32, %arg1: memref<4xi32, #tpu.memory_space<smem>>) -> (i32, i32, i32) {
    %c0_i32 = arith.constant 0 : i32
    %c0_i32_0 = arith.constant 0 : i32
    %c0_i32_1 = arith.constant 0 : i32
    return %arg0, %c0_i32, %c0_i32_0 : i32, i32, i32
  }
  func.func @transform_2(%arg0: i32, %arg1: memref<4xi32, #tpu.memory_space<smem>>) -> (i32, i32, i32) {
    %c0_i32 = arith.constant 0 : i32
    %c0_i32_0 = arith.constant 0 : i32
    %c0_i32_1 = arith.constant 0 : i32
    return %arg0, %c0_i32, %c0_i32_0 : i32, i32, i32
  }
  func.func @transform_3(%arg0: i32, %arg1: memref<4xi32, #tpu.memory_space<smem>>) -> (i32, i32, i32, i32) {
    %c0_i32 = arith.constant 0 : i32
    %c0_i32_0 = arith.constant 0 : i32
    %c0_i32_1 = arith.constant 0 : i32
    %c0_i32_2 = arith.constant 0 : i32
    return %arg0, %c0_i32, %c0_i32_0, %c0_i32_1 : i32, i32, i32, i32
  }
}

module attributes {stable_mosaic.version = 11 : i64} {
  func.func @_disc_kernel(%arg0: i32, %arg1: memref<27x256xbf16, #tpu.memory_space<vmem>>, %arg2: memref<8x27xbf16, #tpu.memory_space<vmem>>, %arg3: memref<8x1xf32, #tpu.memory_space<vmem>>, %arg4: memref<64x9xbf16, #tpu.memory_space<vmem>>, %arg5: memref<16x8x9xf32, #tpu.memory_space<vmem>>, %arg6: memref<16x1xf32, #tpu.memory_space<vmem>>, %arg7: memref<16x1024xbf16, #tpu.memory_space<vmem>>, %arg8: memref<1x1024xf32, #tpu.memory_space<vmem>>, %arg9: memref<1024x128xbf16, #tpu.memory_space<vmem>>, %arg10: memref<1x128xf32, #tpu.memory_space<vmem>>, %arg11: memref<4x7xf32, #tpu.memory_space<vmem>>, %arg12: memref<4x128xf32, #tpu.memory_space<vmem>>) attributes {dimension_semantics = [#tpu.dimension_semantics<parallel>], iteration_bounds = array<i64: 1>, scalar_prefetch = 0 : i64, scratch_operands = 0 : i64, tpu.core_type = #tpu.core_type<tc>, window_params = [{transform_indices = @transform_0, window_bounds = array<i64: 27, 256>}, {pipeline_mode = #tpu.pipeline_mode<synchronous>, transform_indices = @transform_1, window_bounds = array<i64: 8, 27>}, {pipeline_mode = #tpu.pipeline_mode<synchronous>, transform_indices = @transform_2, window_bounds = array<i64: 8, 1>}, {pipeline_mode = #tpu.pipeline_mode<synchronous>, transform_indices = @transform_3, window_bounds = array<i64: 64, 9>}, {pipeline_mode = #tpu.pipeline_mode<synchronous>, transform_indices = @transform_4, window_bounds = array<i64: 16, 8, 9>}, {pipeline_mode = #tpu.pipeline_mode<synchronous>, transform_indices = @transform_5, window_bounds = array<i64: 16, 1>}, {pipeline_mode = #tpu.pipeline_mode<synchronous>, transform_indices = @transform_6, window_bounds = array<i64: 16, 1024>}, {pipeline_mode = #tpu.pipeline_mode<synchronous>, transform_indices = @transform_7, window_bounds = array<i64: 1, 1024>}, {pipeline_mode = #tpu.pipeline_mode<synchronous>, transform_indices = @transform_8, window_bounds = array<i64: 1024, 128>}, {pipeline_mode = #tpu.pipeline_mode<synchronous>, transform_indices = @transform_9, window_bounds = array<i64: 1, 128>}, {transform_indices = @transform_10, window_bounds = array<i64: 4, 7>}, {transform_indices = @transform_11, window_bounds = array<i64: 4, 128>}]} {
    %c0 = arith.constant 0 : index
    %c0_0 = arith.constant 0 : index
    %0 = vector.load %arg2[%c0, %c0_0] : memref<8x27xbf16, #tpu.memory_space<vmem>>, vector<8x27xbf16>
    %c0_1 = arith.constant 0 : index
    %c0_2 = arith.constant 0 : index
    %1 = vector.load %arg1[%c0_1, %c0_2] : memref<27x256xbf16, #tpu.memory_space<vmem>>, vector<27x256xbf16>
    %cst = arith.constant dense<0.000000e+00> : vector<8x256xf32>
    %2 = tpu.matmul %0, %1, %cst {dimension_numbers = #tpu.dot_dimension_numbers<[1], [0], [0], [1], [0, 0, 1, 1], [], []>} : vector<8x27xbf16>, vector<27x256xbf16>, vector<8x256xf32> -> vector<8x256xf32>
    %c0_3 = arith.constant 0 : index
    %c0_4 = arith.constant 0 : index
    %3 = vector.load %arg3[%c0_3, %c0_4] : memref<8x1xf32, #tpu.memory_space<vmem>>, vector<8x1xf32>
    %4 = vector.broadcast %3 : vector<8x1xf32> to vector<8x256xf32>
    %5 = arith.addf %2, %4 : vector<8x256xf32>
    %cst_5 = arith.constant 0.000000e+00 : f32
    %6 = vector.broadcast %cst_5 : f32 to vector<8x256xf32>
    %7 = arith.maximumf %5, %6 : vector<8x256xf32>
    %8 = arith.truncf %7 : vector<8x256xf32> to vector<8x256xbf16>
    %9 = vector.extract_strided_slice %8 {offsets = [0, 0], sizes = [8, 64], strides = [1, 1]} : vector<8x256xbf16> to vector<8x64xbf16>
    %c0_6 = arith.constant 0 : index
    %c0_7 = arith.constant 0 : index
    %10 = vector.load %arg4[%c0_6, %c0_7] : memref<64x9xbf16, #tpu.memory_space<vmem>>, vector<64x9xbf16>
    %cst_8 = arith.constant dense<0.000000e+00> : vector<8x9xf32>
    %11 = tpu.matmul %9, %10, %cst_8 {dimension_numbers = #tpu.dot_dimension_numbers<[1], [0], [0], [1], [0, 0, 1, 1], [], []>} : vector<8x64xbf16>, vector<64x9xbf16>, vector<8x9xf32> -> vector<8x9xf32>
    %c0_9 = arith.constant 0 : index
    %c0_10 = arith.constant 0 : index
    %c0_11 = arith.constant 0 : index
    %12 = vector.load %arg5[%c0_9, %c0_10, %c0_11] : memref<16x8x9xf32, #tpu.memory_space<vmem>>, vector<16x8x9xf32>
    %13 = vector.shape_cast %11 : vector<8x9xf32> to vector<1x8x9xf32>
    %14 = vector.broadcast %13 : vector<1x8x9xf32> to vector<16x8x9xf32>
    %15 = arith.mulf %12, %14 : vector<16x8x9xf32>
    %cst_12 = arith.constant dense<0.000000e+00> : vector<16x8xf32>
    %16 = vector.multi_reduction <add>, %15, %cst_12 [2] : vector<16x8x9xf32> to vector<16x8xf32>
    %cst_13 = arith.constant dense<0.000000e+00> : vector<16xf32>
    %17 = vector.multi_reduction <add>, %16, %cst_13 [1] : vector<16x8xf32> to vector<16xf32>
    %18 = vector.shape_cast %17 : vector<16xf32> to vector<16x1xf32>
    %19 = vector.extract_strided_slice %8 {offsets = [0, 64], sizes = [8, 64], strides = [1, 1]} : vector<8x256xbf16> to vector<8x64xbf16>
    %c0_14 = arith.constant 0 : index
    %c0_15 = arith.constant 0 : index
    %20 = vector.load %arg4[%c0_14, %c0_15] : memref<64x9xbf16, #tpu.memory_space<vmem>>, vector<64x9xbf16>
    %cst_16 = arith.constant dense<0.000000e+00> : vector<8x9xf32>
    %21 = tpu.matmul %19, %20, %cst_16 {dimension_numbers = #tpu.dot_dimension_numbers<[1], [0], [0], [1], [0, 0, 1, 1], [], []>} : vector<8x64xbf16>, vector<64x9xbf16>, vector<8x9xf32> -> vector<8x9xf32>
    %c0_17 = arith.constant 0 : index
    %c0_18 = arith.constant 0 : index
    %c0_19 = arith.constant 0 : index
    %22 = vector.load %arg5[%c0_17, %c0_18, %c0_19] : memref<16x8x9xf32, #tpu.memory_space<vmem>>, vector<16x8x9xf32>
    %23 = vector.shape_cast %21 : vector<8x9xf32> to vector<1x8x9xf32>
    %24 = vector.broadcast %23 : vector<1x8x9xf32> to vector<16x8x9xf32>
    %25 = arith.mulf %22, %24 : vector<16x8x9xf32>
    %cst_20 = arith.constant dense<0.000000e+00> : vector<16x8xf32>
    %26 = vector.multi_reduction <add>, %25, %cst_20 [2] : vector<16x8x9xf32> to vector<16x8xf32>
    %cst_21 = arith.constant dense<0.000000e+00> : vector<16xf32>
    %27 = vector.multi_reduction <add>, %26, %cst_21 [1] : vector<16x8xf32> to vector<16xf32>
    %28 = vector.shape_cast %27 : vector<16xf32> to vector<16x1xf32>
    %29 = vector.extract_strided_slice %8 {offsets = [0, 128], sizes = [8, 64], strides = [1, 1]} : vector<8x256xbf16> to vector<8x64xbf16>
    %c0_22 = arith.constant 0 : index
    %c0_23 = arith.constant 0 : index
    %30 = vector.load %arg4[%c0_22, %c0_23] : memref<64x9xbf16, #tpu.memory_space<vmem>>, vector<64x9xbf16>
    %cst_24 = arith.constant dense<0.000000e+00> : vector<8x9xf32>
    %31 = tpu.matmul %29, %30, %cst_24 {dimension_numbers = #tpu.dot_dimension_numbers<[1], [0], [0], [1], [0, 0, 1, 1], [], []>} : vector<8x64xbf16>, vector<64x9xbf16>, vector<8x9xf32> -> vector<8x9xf32>
    %c0_25 = arith.constant 0 : index
    %c0_26 = arith.constant 0 : index
    %c0_27 = arith.constant 0 : index
    %32 = vector.load %arg5[%c0_25, %c0_26, %c0_27] : memref<16x8x9xf32, #tpu.memory_space<vmem>>, vector<16x8x9xf32>
    %33 = vector.shape_cast %31 : vector<8x9xf32> to vector<1x8x9xf32>
    %34 = vector.broadcast %33 : vector<1x8x9xf32> to vector<16x8x9xf32>
    %35 = arith.mulf %32, %34 : vector<16x8x9xf32>
    %cst_28 = arith.constant dense<0.000000e+00> : vector<16x8xf32>
    %36 = vector.multi_reduction <add>, %35, %cst_28 [2] : vector<16x8x9xf32> to vector<16x8xf32>
    %cst_29 = arith.constant dense<0.000000e+00> : vector<16xf32>
    %37 = vector.multi_reduction <add>, %36, %cst_29 [1] : vector<16x8xf32> to vector<16xf32>
    %38 = vector.shape_cast %37 : vector<16xf32> to vector<16x1xf32>
    %39 = vector.extract_strided_slice %8 {offsets = [0, 192], sizes = [8, 64], strides = [1, 1]} : vector<8x256xbf16> to vector<8x64xbf16>
    %c0_30 = arith.constant 0 : index
    %c0_31 = arith.constant 0 : index
    %40 = vector.load %arg4[%c0_30, %c0_31] : memref<64x9xbf16, #tpu.memory_space<vmem>>, vector<64x9xbf16>
    %cst_32 = arith.constant dense<0.000000e+00> : vector<8x9xf32>
    %41 = tpu.matmul %39, %40, %cst_32 {dimension_numbers = #tpu.dot_dimension_numbers<[1], [0], [0], [1], [0, 0, 1, 1], [], []>} : vector<8x64xbf16>, vector<64x9xbf16>, vector<8x9xf32> -> vector<8x9xf32>
    %c0_33 = arith.constant 0 : index
    %c0_34 = arith.constant 0 : index
    %c0_35 = arith.constant 0 : index
    %42 = vector.load %arg5[%c0_33, %c0_34, %c0_35] : memref<16x8x9xf32, #tpu.memory_space<vmem>>, vector<16x8x9xf32>
    %43 = vector.shape_cast %41 : vector<8x9xf32> to vector<1x8x9xf32>
    %44 = vector.broadcast %43 : vector<1x8x9xf32> to vector<16x8x9xf32>
    %45 = arith.mulf %42, %44 : vector<16x8x9xf32>
    %cst_36 = arith.constant dense<0.000000e+00> : vector<16x8xf32>
    %46 = vector.multi_reduction <add>, %45, %cst_36 [2] : vector<16x8x9xf32> to vector<16x8xf32>
    %cst_37 = arith.constant dense<0.000000e+00> : vector<16xf32>
    %47 = vector.multi_reduction <add>, %46, %cst_37 [1] : vector<16x8xf32> to vector<16xf32>
    %48 = vector.shape_cast %47 : vector<16xf32> to vector<16x1xf32>
    %49 = tpu.concatenate %18, %28, %38, %48 in 1 : vector<16x1xf32>, vector<16x1xf32>, vector<16x1xf32>, vector<16x1xf32> -> vector<16x4xf32>
    %cst_38 = arith.constant 6.250000e-02 : f32
    %50 = vector.broadcast %cst_38 : f32 to vector<16x4xf32>
    %51 = arith.mulf %49, %50 : vector<16x4xf32>
    %c0_39 = arith.constant 0 : index
    %c0_40 = arith.constant 0 : index
    %52 = vector.load %arg6[%c0_39, %c0_40] : memref<16x1xf32, #tpu.memory_space<vmem>>, vector<16x1xf32>
    %53 = vector.broadcast %52 : vector<16x1xf32> to vector<16x4xf32>
    %54 = arith.addf %51, %53 : vector<16x4xf32>
    %55 = arith.truncf %54 : vector<16x4xf32> to vector<16x4xbf16>
    %c0_41 = arith.constant 0 : index
    %c0_42 = arith.constant 0 : index
    %56 = vector.load %arg7[%c0_41, %c0_42] : memref<16x1024xbf16, #tpu.memory_space<vmem>>, vector<16x1024xbf16>
    %cst_43 = arith.constant dense<0.000000e+00> : vector<4x1024xf32>
    %57 = tpu.matmul %55, %56, %cst_43 {dimension_numbers = #tpu.dot_dimension_numbers<[0], [0], [1], [1], [0, 1, 1, 1], [], []>} : vector<16x4xbf16>, vector<16x1024xbf16>, vector<4x1024xf32> -> vector<4x1024xf32>
    %c0_44 = arith.constant 0 : index
    %c0_45 = arith.constant 0 : index
    %58 = vector.load %arg8[%c0_44, %c0_45] : memref<1x1024xf32, #tpu.memory_space<vmem>>, vector<1x1024xf32>
    %59 = vector.broadcast %58 : vector<1x1024xf32> to vector<4x1024xf32>
    %60 = arith.addf %57, %59 : vector<4x1024xf32>
    %61 = arith.truncf %60 : vector<4x1024xf32> to vector<4x1024xbf16>
    %c0_46 = arith.constant 0 : index
    %c0_47 = arith.constant 0 : index
    %62 = vector.load %arg9[%c0_46, %c0_47] : memref<1024x128xbf16, #tpu.memory_space<vmem>>, vector<1024x128xbf16>
    %cst_48 = arith.constant dense<0.000000e+00> : vector<4x128xf32>
    %63 = tpu.matmul %61, %62, %cst_48 {dimension_numbers = #tpu.dot_dimension_numbers<[1], [0], [0], [1], [0, 0, 1, 1], [], []>} : vector<4x1024xbf16>, vector<1024x128xbf16>, vector<4x128xf32> -> vector<4x128xf32>
    %c0_49 = arith.constant 0 : index
    %c0_50 = arith.constant 0 : index
    %64 = vector.load %arg10[%c0_49, %c0_50] : memref<1x128xf32, #tpu.memory_space<vmem>>, vector<1x128xf32>
    %65 = vector.broadcast %64 : vector<1x128xf32> to vector<4x128xf32>
    %66 = arith.addf %63, %65 : vector<4x128xf32>
    %67 = vector.extract_strided_slice %66 {offsets = [0, 1], sizes = [4, 7], strides = [1, 1]} : vector<4x128xf32> to vector<4x7xf32>
    %cst_51 = arith.constant dense<0xFF800000> : vector<4xf32>
    %68 = vector.multi_reduction <maximumf>, %67, %cst_51 [1] : vector<4x7xf32> to vector<4xf32>
    %69 = vector.shape_cast %68 : vector<4xf32> to vector<4x1xf32>
    %70 = vector.broadcast %69 : vector<4x1xf32> to vector<4x7xf32>
    %71 = arith.subf %67, %70 : vector<4x7xf32>
    %72 = math.exp %71 : vector<4x7xf32>
    %cst_52 = arith.constant dense<0.000000e+00> : vector<4xf32>
    %73 = vector.multi_reduction <add>, %72, %cst_52 [1] : vector<4x7xf32> to vector<4xf32>
    %74 = vector.shape_cast %73 : vector<4xf32> to vector<4x1xf32>
    %75 = math.log %74 : vector<4x1xf32>
    %76 = arith.addf %75, %69 : vector<4x1xf32>
    %c0_53 = arith.constant 0 : index
    %c0_54 = arith.constant 0 : index
    %77 = vector.load %arg11[%c0_53, %c0_54] : memref<4x7xf32, #tpu.memory_space<vmem>>, vector<4x7xf32>
    %78 = arith.mulf %67, %77 : vector<4x7xf32>
    %cst_55 = arith.constant dense<0.000000e+00> : vector<4xf32>
    %79 = vector.multi_reduction <add>, %78, %cst_55 [1] : vector<4x7xf32> to vector<4xf32>
    %80 = vector.shape_cast %79 : vector<4xf32> to vector<4x1xf32>
    %81 = arith.subf %76, %80 : vector<4x1xf32>
    %82 = tpu.iota {dimensions = array<i32: 1>} : vector<4x128xi32>
    %c8_i32 = arith.constant 8 : i32
    %83 = vector.broadcast %c8_i32 : i32 to vector<4x128xi32>
    %84 = arith.cmpi eq, %82, %83 : vector<4x128xi32>
    %85 = vector.shape_cast %81 : vector<4x1xf32> to vector<4x1xf32>
    %86 = vector.broadcast %85 : vector<4x1xf32> to vector<4x128xf32>
    %87 = arith.select %84, %86, %66 : vector<4x128xi1>, vector<4x128xf32>
    %c0_56 = arith.constant 0 : index
    %c0_57 = arith.constant 0 : index
    %88 = vector.load %arg12[%c0_56, %c0_57] : memref<4x128xf32, #tpu.memory_space<vmem>>, vector<4x128xf32>
    tpu.vector_store %arg12[%c0_56, %c0_57], %87 {strides = array<i32>} : memref<4x128xf32, #tpu.memory_space<vmem>>, vector<4x128xf32>,
    return
  }
  func.func @transform_0(%arg0: i32) -> (i32, i32) {
    %c0_i32 = arith.constant 0 : i32
    %c0_i32_0 = arith.constant 0 : i32
    return %c0_i32, %arg0 : i32, i32
  }
  func.func @transform_1(%arg0: i32) -> (i32, i32) {
    %c0_i32 = arith.constant 0 : i32
    %c0_i32_0 = arith.constant 0 : i32
    %c0_i32_1 = arith.constant 0 : i32
    return %c0_i32, %c0_i32_0 : i32, i32
  }
  func.func @transform_2(%arg0: i32) -> (i32, i32) {
    %c0_i32 = arith.constant 0 : i32
    %c0_i32_0 = arith.constant 0 : i32
    %c0_i32_1 = arith.constant 0 : i32
    return %c0_i32, %c0_i32_0 : i32, i32
  }
  func.func @transform_3(%arg0: i32) -> (i32, i32) {
    %c0_i32 = arith.constant 0 : i32
    %c0_i32_0 = arith.constant 0 : i32
    %c0_i32_1 = arith.constant 0 : i32
    return %c0_i32, %c0_i32_0 : i32, i32
  }
  func.func @transform_4(%arg0: i32) -> (i32, i32, i32) {
    %c0_i32 = arith.constant 0 : i32
    %c0_i32_0 = arith.constant 0 : i32
    %c0_i32_1 = arith.constant 0 : i32
    %c0_i32_2 = arith.constant 0 : i32
    return %c0_i32, %c0_i32_0, %c0_i32_1 : i32, i32, i32
  }
  func.func @transform_5(%arg0: i32) -> (i32, i32) {
    %c0_i32 = arith.constant 0 : i32
    %c0_i32_0 = arith.constant 0 : i32
    %c0_i32_1 = arith.constant 0 : i32
    return %c0_i32, %c0_i32_0 : i32, i32
  }
  func.func @transform_6(%arg0: i32) -> (i32, i32) {
    %c0_i32 = arith.constant 0 : i32
    %c0_i32_0 = arith.constant 0 : i32
    %c0_i32_1 = arith.constant 0 : i32
    return %c0_i32, %c0_i32_0 : i32, i32
  }
  func.func @transform_7(%arg0: i32) -> (i32, i32) {
    %c0_i32 = arith.constant 0 : i32
    %c0_i32_0 = arith.constant 0 : i32
    %c0_i32_1 = arith.constant 0 : i32
    return %c0_i32, %c0_i32_0 : i32, i32
  }
  func.func @transform_8(%arg0: i32) -> (i32, i32) {
    %c0_i32 = arith.constant 0 : i32
    %c0_i32_0 = arith.constant 0 : i32
    %c0_i32_1 = arith.constant 0 : i32
    return %c0_i32, %c0_i32_0 : i32, i32
  }
  func.func @transform_9(%arg0: i32) -> (i32, i32) {
    %c0_i32 = arith.constant 0 : i32
    %c0_i32_0 = arith.constant 0 : i32
    %c0_i32_1 = arith.constant 0 : i32
    return %c0_i32, %c0_i32_0 : i32, i32
  }
  func.func @transform_10(%arg0: i32) -> (i32, i32) {
    %c0_i32 = arith.constant 0 : i32
    %c0_i32_0 = arith.constant 0 : i32
    return %arg0, %c0_i32 : i32, i32
  }
  func.func @transform_11(%arg0: i32) -> (i32, i32) {
    %c0_i32 = arith.constant 0 : i32
    %c0_i32_0 = arith.constant 0 : i32
    return %arg0, %c0_i32 : i32, i32
  }
}

</mosaic_0001>

<bundles_post_ra>
// kernel: ac_crop_discriminator_forward.2
= control target key start
LH: loop header
LB: loop body
LE: loop exit
PB: predicated region body
PF: predicated region fallthrough
CT: control target
= control target key end

     0   :  { %s830_s0 = inlined_call_operand.vmem [shape: s32[4], index: 0, kind: input, shape index: {}]   ;;  %s831_s1 = inlined_call_operand.vmem [shape: f32[2,16,48], index: 1, kind: input, shape index: {}]   ;;  %s832_s2 = inlined_call_operand.vmem [shape: f32[4,16,16], index: 2, kind: input, shape index: {}]   ;;  %s833_s3 = inlined_call_operand.vmem [shape: f32[4,16,16], index: 3, kind: input, shape index: {}]   ;;  %s834_s4 = inlined_call_operand.vmem [shape: f32[4,3,16,16], index: 4, kind: output, shape index: {}]  }
   0x1   :  { %s9_s17 = sshll.u32 %s830_s0, 4  ;;  %s10_s17 = int_to_ptr.vmem [resolvable:$true] %s9_s17 }
   0x2   :  { %s736_s18 = scalar_lea.vmem %s10_s17, 16  ;;  %p741_p1 = scmp.lt.s32.totalorder %s10_s17, %s10_s17 }
   0x3   :  { %p737_p0 = scmp.ne.s32.totalorder %s10_s17, %s736_s18  ;;  %p742_p2 = scmp.lt.s32.totalorder %s736_s18, %s736_s18 }
   0x5   :  { %p743_p3 = por %p742_p2, %p741_p1 }
   0x7   :  { %p744_p4 = pnand %p743_p3, %p737_p0 }
   0x9   :  { %747 = shalt.err (!%p744_p4)  }
   0xa   :  { %s758_s19 = smov [#allocation3]  }
   0xb   :  { %12 = dma.vmem_to_smem %s10_s17, 16, %s758_s19, [#allocation2] }
   0xc   :  { %752 = dma.done.wait [#allocation2], 16 }
   0xd   :  { %753 = vsyncadd [#allocation2], 4294967280 }
   0xe   :  { %14 = sfence }
   0xf   :  { %s789_s20 = smov 0  }
  0x10 LB: > { %s651_s0 = sadd.s32 4294967295, %s756_s20   ;;  %p655_p5 = scmp.ge.s32.totalorder %s756_s20, 1  ;;  %s756_s20 = sphi %s789_s20, %s20_s20  }
  0x11   : > { %p168_p6 = scmp.lt.s32.totalorder %s756_s20, 5 }
  0x13   : > { %p169_p7 = pnand %p655_p5, %p168_p6 }
  0x14   : > { %s203_s21 = sld [smem:[#allocation3 + %s651_s0]] (!%p169_p7)  ;;  %p210_p8 = scmp.lt.s32.totalorder (!%p169_p7), %s651_s0, 3 }
  0x15   : > { %172 = sbr.rel (%p169_p7) target bundleno = 547 (0x223), region = 32  ;;  %s759_s7 = smov (!%p169_p7), 112  }
  0x16   : > { %s760_s8 = smov (!%p169_p7), 96  }
  0x1a   : > { %s836_s0 = smov (!%p210_p8, %s651_s0), 3  ;;  %vm229_vm0 = vcmask 130048   ;;  %p204_p9 = scmp.lt.s32.totalorder %s203_s21, 1 }
  0x1b   : > { %s678_s22 = sshll.u32 %s836_s0, 4  ;;  %s724_s9 = smul.u32 48, %s836_s0 }
  0x1c   : > { %s214_s25 = scalar_lea.vmem %s832_s2, %s678_s22  ;;  %s838_s21 = smov (!%p204_p9, %s203_s21), 1 }
  0x1d   : > { %v225_v0 = vld [vmem:[%s214_s25] sm:$0xff]  ;;  %s677_s26 = sshll.u32 %s838_s21, 4  ;;  %v226_v3 = vld [vmem:[%s214_s25 + $0x8] sm:$0xff]  ;;  %s219_s6 = scalar_lea.vmem %s833_s3, %s678_s22 }
  0x1e   : > { %700 = vmatprep.mubr.msk.f32.mxu0 %vm229_vm0, %v225_v0  ;;  %s208_s29 = scalar_lea.vmem %s831_s1, %s677_s26  ;;  %v312_v4 = vld [vmem:[%s219_s6 + $0x8] sm:$0xff]  ;;  %v311_v5 = vld [vmem:[%s219_s6] sm:$0xff]  ;;  %s224_s12 = scalar_lea.vmem %s834_s4, %s724_s9 }
  0x1f   : > { %v228_v1 = vld [vmem:[%s208_s29 + $0x8] sm:$0xff]  ;;  %v227_v2 = vld [vmem:[%s208_s29] sm:$0xff]  ;;  %703 = vmatprep.subr.mxu1 %v312_v4 }
  0x20   : > { %696 = vmatprep.subr.mxu0 %v228_v1  ;;  %704 = vmatpush3.msra.mxu1 %v312_v4 }
  0x21   : > { %697 = vmatpush3.msra.mxu0 %v228_v1  ;;  %705 = vmatprep.subr.mxu1 %v311_v5 }
  0x22   : > { %698 = vmatprep.subr.mxu0 %v227_v2  ;;  %706 = vmatpush3.msra.mxu1 %v311_v5 }
  0x23   : > { %699 = vmatpush3.msra.mxu0 %v227_v2  ;;  %717 = vmatprep.subr.mxu1 %v312_v4 }
  0x24   : > { %701 = vmatmul.mubr.msk.f32.vlgmr.msra.gmra.mxu0 %vm229_vm0, %v226_v3  ;;  %710 = vmatprep.subr.mxu0 %v312_v4 }
  0x25   : > { %711 = vmatpush3.msra.mxu0 %v312_v4 }
  0x26   : > { %712 = vmatprep.subr.mxu0 %v311_v5 }
  0x27   : > { %713 = vmatpush3.msra.mxu0 %v311_v5 }
  0xe4   : > { %v702_v6 = vpop.f32.mrf.mxu0 }
  0xe5   : > { %400 = vrot.lane.b32.xlu1 %v702_v6, %s759_s7 }
  0xe6   : > { %v302_v7 = vpop.f32.mrf.mxu0 }
  0xe7   : > { %398 = vrot.lane.b32.xlu0 %v302_v7, %s759_s7  ;;  %707 = vmatprep.mubr.msk.f32.mxu1 %vm229_vm0, %v302_v7 }
  0xe8   : > { %708 = vmatmul.mubr.msk.f32.vlgmr.msra.gmra.mxu1 %vm229_vm0, %v702_v6 }
  0xe9   : > { %488 = vrot.lane.b32.xlu1 %v702_v6, %s760_s8  ;;  %718 = vmatpush3.msra.mxu1 %v312_v4 }
  0xea   : > { %719 = vmatprep.subr.mxu1 %v311_v5 }
  0xeb   : > { %486 = vrot.lane.b32.xlu0 %v302_v7, %s760_s8  ;;  %720 = vmatpush3.msra.mxu1 %v311_v5 }
 0x157   : > { %v401_v8 = vpop.permute.xlu1 %400 }
 0x159   : > { %v399_v9 = vpop.permute.xlu0 %398 }
 0x15a   : > { %714 = vmatprep.mubr.msk.f32.mxu0 %vm229_vm0, %v399_v9 }
 0x15b   : > { %715 = vmatmul.mubr.msk.f32.vlgmr.msra.gmra.mxu0 %vm229_vm0, %v401_v8  ;;  %v489_v11 = vpop.permute.xlu1 %488 }
 0x15d   : > { %v487_v10 = vpop.permute.xlu0 %486 }
 0x15e   : > { %721 = vmatprep.mubr.msk.f32.mxu1 %vm229_vm0, %v487_v10 }
 0x15f   : > { %722 = vmatmul.mubr.msk.f32.vlgmr.msra.gmra.mxu1 %vm229_vm0, %v489_v11 }
 0x1a8   : > { %v709_v12 = vpop.f32.mrf.mxu1 }
 0x1a9   : > { %395 = vst.msk [vmem:[%s224_s12 + $0x8] sm:$0xff] %vm229_vm0, %v709_v12 }
 0x1aa   : > { %v385_v13 = vpop.f32.mrf.mxu1 }
 0x1ab   : > { %394 = vst.msk [vmem:[%s224_s12] sm:$0xff] %vm229_vm0, %v385_v13 }
 0x21b   : > { %v716_v14 = vpop.f32.mrf.mxu0 }
 0x21c   : > { %670 = vst.msk [vmem:[%s224_s12 + $0x18] sm:$0xff] %vm229_vm0, %v716_v14 }
 0x21d   : > { %v472_v15 = vpop.f32.mrf.mxu0 }
 0x21e   : > { %669 = vst.msk [vmem:[%s224_s12 + $0x10] sm:$0xff] %vm229_vm0, %v472_v15 }
 0x21f   : > { %v723_v16 = vpop.f32.mrf.mxu1 }
 0x220   : > { %674 = vst.msk [vmem:[%s224_s12 + $0x28] sm:$0xff] %vm229_vm0, %v723_v16 }
 0x221   : > { %v560_v17 = vpop.f32.mrf.mxu1 }
 0x222   : > { %673 = vst.msk [vmem:[%s224_s12 + $0x20] sm:$0xff] %vm229_vm0, %v560_v17 }
 0x223 PF: > { %s20_s20 = sadd.s32 1, %s756_s20  }
 0x224   : > { %p17_p10 = scmp.ge.s32.totalorder %s20_s20, 6  }
 0x226   :  { %19 = sbr.rel (!%p17_p10) target bundleno = 16 (0x10), region = 70 }

// kernel: ac_crop_discriminator_forward.3
= control target key start
LH: loop header
LB: loop body
LE: loop exit
PB: predicated region body
PF: predicated region fallthrough
CT: control target
= control target key end

     0   :  { %vm72_vm0 = vcmask 1044480   ;;  %vm73_vm1 = vcmask 1045504   ;;  %v2388_v1 = vmov 0   ;;  %v2389_v2 = vmov 65535   ;;  %s2393_s18 = smov 1   ;;  %s3220_s0 = inlined_call_operand.vmem [shape: bf16[27,256], index: 0, kind: input, shape index: {}]   ;;  %s3221_s2 = inlined_call_operand.vmem [shape: f32[8,1], index: 2, kind: input, shape index: {}]   ;;  %s3222_s3 = inlined_call_operand.vmem [shape: bf16[64,9], index: 3, kind: input, shape index: {}]   ;;  %s3223_s1 = inlined_call_operand.vmem [shape: bf16[8,27], index: 1, kind: input, shape index: {}]   ;;  %s3224_s4 = inlined_call_operand.vmem [shape: f32[16,8,9], index: 4, kind: input, shape index: {}]   ;;  %s3225_s5 = inlined_call_operand.vmem [shape: f32[16,1], index: 5, kind: input, shape index: {}]   ;;  %s3226_s6 = inlined_call_operand.vmem [shape: bf16[16,1024], index: 6, kind: input, shape index: {}]   ;;  %s3227_s8 = inlined_call_operand.vmem [shape: bf16[1024,128], index: 8, kind: input, shape index: {}]   ;;  %s3228_s7 = inlined_call_operand.vmem [shape: f32[1,1024], index: 7, kind: input, shape index: {}]   ;;  %s3229_s9 = inlined_call_operand.vmem [shape: f32[1,128], index: 9, kind: input, shape index: {}]   ;;  %s3230_s10 = inlined_call_operand.vmem [shape: f32[4,7], index: 10, kind: input, shape index: {}]   ;;  %s3231_s11 = inlined_call_operand.vmem [shape: f32[4,128], index: 11, kind: output, shape index: {}]  }
   0x1   :  { %v2310_v0 = vld [vmem:[%s3220_s0 + $0x14] ss:$8 sps:$4 sm:$0x3f]   ;;  %114 = vmatprep.mubr.bf16.mxu0 %v2388_v1  ;;  %2308 = vset.pattern.permute.xlu0 %v2388_v1  ;;  %v74_v3 = vsel %vm72_vm0, 4294967295, %v2389_v2  ;;  %v2313_v8 = vld [vmem:[%s3220_s0 + $0x4] ss:$8 sps:$4 sm:$0xff]  }
   0x2   :  { %v2312_v4 = vld [vmem:[%s3220_s0 + $0x10] ss:$8 sps:$4 sm:$0x3f]   ;;  %2309 = vset.pattern.permute.xlu1 %v2388_v1  ;;  %v75_v5 = vsel %vm73_vm1, %v74_v3, 0  ;;  %v44_v9 = vld [vmem:[%s3221_s2] sm:$0xff]  ;;  %v2390_v10 = vmov 0.0  }
   0x3   :  { %v80_v6 = vand.u32 %v2310_v0, %v75_v5  ;;  %v77_v7 = vand.u32 %v2312_v4, %v75_v5  ;;  %47 = vperm.xlu0 %2308, %v44_v9   ;;  %2253 = vmatprep.subr.bf16.mxu1 %v2390_v10  ;;  %v2316_v11 = vld [vmem:[%s3222_s3 + $0x18] sm:$0xff]   ;;  %v2315_v12 = vld [vmem:[%s3220_s0] ss:$8 sps:$4 sm:$0xff]   ;;  %v2317_v13 = vld [vmem:[%s3222_s3 + $0x10] sm:$0xff]   ;;  %vm68_vm2 = vcmask 220160   ;;  %vm2391_vm3 = vmmov 0  }
   0x4   :  { %2254 = vmatpush3.bf16.msra.mxu1 %v2316_v11  ;;  %v39_v14 = vld [vmem:[%s3223_s1] sm:$0xf]  ;;  %v2318_v15 = vld [vmem:[%s3222_s3 + $0x8] sm:$0xff]   ;;  %2261 = vmatprep.mubr.msk.bf16.mxu1 %vm2391_vm3, %v2390_v10  ;;  %vm159_vm4 = vcmask 523264   ;;  %vm235_vm5 = vcmask 72704   ;;  %v2553_v43 = vld [vmem:[%s3224_s4 + $0x10] sm:$0xff] }
   0x5   :  { %94 = vmatprep.subr.bf16.mxu0 %v80_v6  ;;  %2255 = vmatprep.subr.bf16.mxu1 %v2390_v10  ;;  %v2319_v16 = vld [vmem:[%s3222_s3] sm:$0xff]   ;;  %s2392_s3 = smov 64   ;;  %v2521_v30 = vld [vmem:[%s3224_s4 + $0x8] sm:$0xff]  ;;  %v2558_v44 = vld [vmem:[%s3224_s4 + $0x50] sm:$0xff]  ;;  %vm366_vm6 = vcmask 1041409   ;;  %vm368_vm7 = vcmask 1042434  }
   0x6   :  { %95 = vmatpush1.bf16.msra.mxu0 %v77_v7  ;;  %v2526_v31 = vld [vmem:[%s3224_s4] sm:$0xff]  ;;  %v2538_v34 = vld [vmem:[%s3224_s4 + $0x48] sm:$0xff]  ;;  %v2569_v50 = vld [vmem:[%s3224_s4 + $0x18] sm:$0xff]  ;;  %vm370_vm8 = vcmask 1043459   ;;  %vm372_vm9 = vcmask 1044484   ;;  %vm374_vm10 = vcmask 1045509  }
   0x7   :  { %96 = vmatprep.subr.bf16.mxu0 %v2313_v8  ;;  %v2533_v33 = vld [vmem:[%s3224_s4 + $0x40] sm:$0xff]  ;;  %v2574_v51 = vld [vmem:[%s3224_s4 + $0x58] sm:$0xff]  ;;  %v2603_v63 = vld [vmem:[%s3224_s4 + $0x28] sm:$0xff]  ;;  %vm376_vm11 = vcmask 1046534   ;;  %vm378_vm12 = vcmask 1047559   ;;  %vm389_vm13 = vcmask 64512  }
   0x8   :  { %2256 = vmatpush3.bf16.msra.mxu1 %v2317_v13  ;;  %v2585_v56 = vld [vmem:[%s3224_s4 + $0x20] sm:$0xff]  ;;  %v2608_v0 = vld [vmem:[%s3224_s4 + $0x68] sm:$0xff]  ;;  %v2619_v8 = vld [vmem:[%s3224_s4 + $0x30] sm:$0xff]  ;;  %vm1029_vm14 = vcmask 7168   ;;  %vm1032_vm15 = vcmask 15360   ;;  %vm1035_vm0 = vcmask 23552  }
   0x9   :  { %2257 = vmatprep.subr.bf16.mxu1 %v2390_v10  ;;  %v2590_v57 = vld [vmem:[%s3224_s4 + $0x60] sm:$0xff]  ;;  %v2624_v9 = vld [vmem:[%s3224_s4 + $0x70] sm:$0xff]  ;;  %vm1161_vm1 = vcmask 130048  }
   0xa   :  { %97 = vmatpush1.bf16.msra.mxu0 %v2315_v12 }
   0xb   :  { %2265 = vmatprep.subr.bf16.mxu0 %v2390_v10 }
   0xc   :  { %2258 = vmatpush3.bf16.msra.mxu1 %v2318_v15 }
   0xd   :  { %2059 = vmatmul.mubr.msk.bf16.vlgmr.msra.gmra.mxu0 %vm68_vm2, %v39_v14  ;;  %2259 = vmatprep.subr.bf16.mxu1 %v2390_v10  ;;  %vm2016_vm2 = vcmask 60424  }
   0xe   :  { %2266 = vmatpush3.bf16.msra.mxu0 %v2316_v11  ;;  %2273 = vmatprep.mubr.msk.bf16.mxu0 %vm2391_vm3, %v2390_v10 }
   0xf   :  { %2267 = vmatprep.subr.bf16.mxu0 %v2390_v10 }
  0x10   :  { %2260 = vmatpush3.bf16.msra.mxu1 %v2319_v16 }
  0x11   :  { %2277 = vmatprep.subr.bf16.mxu1 %v2390_v10 }
  0x12   :  { %2268 = vmatpush3.bf16.msra.mxu0 %v2317_v13 }
  0x13   :  { %2269 = vmatprep.subr.bf16.mxu0 %v2390_v10 }
  0x16   :  { %2270 = vmatpush3.bf16.msra.mxu0 %v2318_v15 }
  0x17   :  { %2271 = vmatprep.subr.bf16.mxu0 %v2390_v10 }
  0x1a   :  { %2272 = vmatpush3.bf16.msra.mxu0 %v2319_v16 }
  0x1b   :  { %2289 = vmatprep.subr.bf16.mxu0 %v2390_v10 }
  0x7e   :  { %v48_v17 = vpop.permute.xlu0 %47 }
  0xcd   :  { %v116_v18 = vpop.f32.mrf.mxu0 }
  0xce   :  { %v117_v19 = vadd.f32 %v116_v18, %v48_v17 }
  0xcf   :  { %v118_v20 = vpop.f32.mrf.mxu0 }
  0xd0   :  { %v123_v21 = vmax.f32 %v117_v19, 0.0  ;;  %v119_v22 = vadd.f32 %v118_v20, %v48_v17 }
  0xd1   :  { %v120_v23 = vpop.f32.mrf.mxu0 }
  0xd2   :  { %v125_v24 = vpack.c.bf16 %v123_v21, %v123_v21  ;;  %v124_v25 = vmax.f32 %v119_v22, 0.0 }
  0xd3   :  { %v121_v26 = vpop.f32.mrf.mxu0 }
  0xd4   :  { %397 = vrot.lane.b32.xlu0 %v125_v24, %s2392_s3  ;;  %2262 = vmatmul.mubr.msk.bf16.vlgmr.msra.gmra.mxu1 %vm159_vm4, %v125_v24  ;;  %v126_v27 = vpack.c.bf16 %v124_v25, %v124_v25 }
  0xd5   :  { %2278 = vmatpush3.bf16.msra.mxu1 %v2316_v11  ;;  %2285 = vmatprep.mubr.msk.bf16.mxu1 %vm2391_vm3, %v2390_v10 }
  0xd6   :  { %818 = vrot.lane.b32.xlu1 %v126_v27, %s2392_s3  ;;  %2279 = vmatprep.subr.bf16.mxu1 %v2390_v10 }
  0xd9   :  { %2280 = vmatpush3.bf16.msra.mxu1 %v2317_v13 }
  0xda   :  { %2281 = vmatprep.subr.bf16.mxu1 %v2390_v10 }
  0xdd   :  { %2282 = vmatpush3.bf16.msra.mxu1 %v2318_v15 }
  0xde   :  { %2283 = vmatprep.subr.bf16.mxu1 %v2390_v10 }
  0xe1   :  { %2284 = vmatpush3.bf16.msra.mxu1 %v2319_v16 }
  0xe4   :  { %2286 = vmatmul.mubr.msk.bf16.vlgmr.msra.gmra.mxu1 %vm159_vm4, %v126_v27 }
  0xe5   :  { %1197 = vmatprep.mubr.bf16.mxu1 %v2388_v1 }
 0x146   :  { %v398_v28 = vpop.permute.xlu0 %397 }
 0x147   :  { %2274 = vmatmul.mubr.msk.bf16.vlgmr.msra.gmra.mxu0 %vm159_vm4, %v398_v28 }
 0x148   :  { %2290 = vmatpush3.bf16.msra.mxu0 %v2316_v11  ;;  %2297 = vmatprep.mubr.msk.bf16.mxu0 %vm2391_vm3, %v2390_v10  ;;  %v819_v29 = vpop.permute.xlu1 %818  ;;  %vm2027_vm3 = vcmask 52224  }
 0x149   :  { %2291 = vmatprep.subr.bf16.mxu0 %v2390_v10 }
 0x14c   :  { %2292 = vmatpush3.bf16.msra.mxu0 %v2317_v13 }
 0x14d   :  { %2293 = vmatprep.subr.bf16.mxu0 %v2390_v10 }
 0x150   :  { %2294 = vmatpush3.bf16.msra.mxu0 %v2318_v15  ;;  %v2635_v15 = vld [vmem:[%s3224_s4 + $0x38] sm:$0xff] }
 0x151   :  { %2295 = vmatprep.subr.bf16.mxu0 %v2390_v10 }
 0x154   :  { %2296 = vmatpush3.bf16.msra.mxu0 %v2319_v16  ;;  %v2640_v16 = vld [vmem:[%s3224_s4 + $0x78] sm:$0xff] }
 0x157   :  { %2298 = vmatmul.mubr.msk.bf16.vlgmr.msra.gmra.mxu0 %vm159_vm4, %v819_v29 }
 0x158   :  { %1238 = vmatprep.mubr.bf16.mxu0 %v2388_v1 }
 0x194   :  { %v2528_v32 = vpop.f32.mrf.mxu1 }
 0x195   :  { %v220_v35 = vmul.f32 %v2521_v30, %v2528_v32  ;;  %v219_v36 = vmul.f32 %v2526_v31, %v2528_v32  ;;  %v227_v40 = vmul.f32 %v2533_v33, %v2528_v32  ;;  %v228_v41 = vmul.f32 %v2538_v34, %v2528_v32 }
 0x196   :  { %v2263_v37 = vpop.f32.mrf.mxu1  ;;  %v221_v48 = vmul.f32 %v2553_v43, %v2528_v32  ;;  %v229_v49 = vmul.f32 %v2558_v44, %v2528_v32  ;;  %v222_v54 = vmul.f32 %v2569_v50, %v2528_v32  ;;  %v230_v55 = vmul.f32 %v2574_v51, %v2528_v32 }
 0x197   :  { %v239_v38 = vsel %vm235_vm5, %v220_v35, 0.0  ;;  %v236_v39 = vsel %vm235_vm5, %v219_v36, 0.0  ;;  %v260_v46 = vsel %vm235_vm5, %v227_v40, 0.0  ;;  %v263_v47 = vsel %vm235_vm5, %v228_v41, 0.0 }
 0x198   :  { %240 = vadd.xlane.f32.xlu0 %v239_v38  ;;  %237 = vadd.xlane.f32.xlu1 %v236_v39  ;;  %v200_v42 = vpop.f32.mrf.mxu1  ;;  %v242_v52 = vsel %vm235_vm5, %v221_v48, 0.0  ;;  %v266_v53 = vsel %vm235_vm5, %v229_v49, 0.0  ;;  %v245_v58 = vsel %vm235_vm5, %v222_v54, 0.0  ;;  %v269_v59 = vsel %vm235_vm5, %v230_v55, 0.0 }
 0x199   :  { %v223_v60 = vmul.f32 %v2585_v56, %v2528_v32  ;;  %v231_v61 = vmul.f32 %v2590_v57, %v2528_v32  ;;  %v224_v5 = vmul.f32 %v2603_v63, %v2528_v32  ;;  %v232_v6 = vmul.f32 %v2608_v0, %v2528_v32 }
 0x19a   :  { %v2264_v45 = vpop.f32.mrf.mxu1  ;;  %v225_v13 = vmul.f32 %v2619_v8, %v2528_v32  ;;  %v233_v14 = vmul.f32 %v2624_v9, %v2528_v32  ;;  %v226_v19 = vmul.f32 %v2635_v15, %v2528_v32  ;;  %v234_v20 = vmul.f32 %v2640_v16, %v2528_v32 }
 0x19b   :  { %v248_v3 = vsel %vm235_vm5, %v223_v60, 0.0  ;;  %v272_v4 = vsel %vm235_vm5, %v231_v61, 0.0  ;;  %v251_v11 = vsel %vm235_vm5, %v224_v5, 0.0  ;;  %v275_v12 = vsel %vm235_vm5, %v232_v6, 0.0 }
 0x19c   :  { %261 = vadd.xlane.f32.xlu0 %v260_v46  ;;  %264 = vadd.xlane.f32.xlu1 %v263_v47  ;;  %v254_v17 = vsel %vm235_vm5, %v225_v13, 0.0  ;;  %v278_v18 = vsel %vm235_vm5, %v233_v14, 0.0  ;;  %v257_v21 = vsel %vm235_vm5, %v226_v19, 0.0  ;;  %v281_v22 = vsel %vm235_vm5, %v234_v20, 0.0 }
 0x1a0   :  { %243 = vadd.xlane.f32.xlu0 %v242_v52  ;;  %267 = vadd.xlane.f32.xlu1 %v266_v53 }
 0x1a4   :  { %v2598_v62 = vpop.f32.mrf.mxu1  ;;  %246 = vadd.xlane.f32.xlu0 %v245_v58  ;;  %270 = vadd.xlane.f32.xlu1 %v269_v59 }
 0x1a5   :  { %v652_v23 = vmul.f32 %v2598_v62, %v2521_v30  ;;  %v651_v24 = vmul.f32 %v2598_v62, %v2526_v31  ;;  %v660_v27 = vmul.f32 %v2598_v62, %v2538_v34  ;;  %v659_v28 = vmul.f32 %v2598_v62, %v2533_v33 }
 0x1a6   :  { %v2287_v2 = vpop.f32.mrf.mxu1  ;;  %v661_v35 = vmul.f32 %v2598_v62, %v2558_v44  ;;  %v653_v36 = vmul.f32 %v2598_v62, %v2553_v43  ;;  %v662_v39 = vmul.f32 %v2598_v62, %v2574_v51  ;;  %v654_v40 = vmul.f32 %v2598_v62, %v2569_v50 }
 0x1a7   :  { %v670_v25 = vsel %vm235_vm5, %v652_v23, 0.0  ;;  %v667_v26 = vsel %vm235_vm5, %v651_v24, 0.0  ;;  %v694_v29 = vsel %vm235_vm5, %v660_v27, 0.0  ;;  %v691_v32 = vsel %vm235_vm5, %v659_v28, 0.0 }
 0x1a8   :  { %v648_v7 = vpop.f32.mrf.mxu1  ;;  %249 = vadd.xlane.f32.xlu0 %v248_v3  ;;  %273 = vadd.xlane.f32.xlu1 %v272_v4  ;;  %v697_v37 = vsel %vm235_vm5, %v661_v35, 0.0  ;;  %v673_v38 = vsel %vm235_vm5, %v653_v36, 0.0  ;;  %v700_v41 = vsel %vm235_vm5, %v662_v39, 0.0  ;;  %v676_v42 = vsel %vm235_vm5, %v654_v40, 0.0 }
 0x1a9   :  { %v663_v45 = vmul.f32 %v2598_v62, %v2590_v57  ;;  %v655_v46 = vmul.f32 %v2598_v62, %v2585_v56  ;;  %v664_v49 = vmul.f32 %v2598_v62, %v2608_v0  ;;  %v656_v52 = vmul.f32 %v2598_v62, %v2603_v63 }
 0x1aa   :  { %v2288_v10 = vpop.f32.mrf.mxu1  ;;  %v665_v55 = vmul.f32 %v2598_v62, %v2624_v9  ;;  %v657_v58 = vmul.f32 %v2598_v62, %v2619_v8  ;;  %v666_v61 = vmul.f32 %v2598_v62, %v2640_v16  ;;  %v658_v2 = vmul.f32 %v2598_v62, %v2635_v15 }
 0x1ab   :  { %v703_v47 = vsel %vm235_vm5, %v663_v45, 0.0  ;;  %v679_v48 = vsel %vm235_vm5, %v655_v46, 0.0  ;;  %v706_v53 = vsel %vm235_vm5, %v664_v49, 0.0  ;;  %v682_v54 = vsel %vm235_vm5, %v656_v52, 0.0 }
 0x1ac   :  { %252 = vadd.xlane.f32.xlu0 %v251_v11  ;;  %276 = vadd.xlane.f32.xlu1 %v275_v12  ;;  %v709_v59 = vsel %vm235_vm5, %v665_v55, 0.0  ;;  %v685_v60 = vsel %vm235_vm5, %v657_v58, 0.0  ;;  %v712_v3 = vsel %vm235_vm5, %v666_v61, 0.0  ;;  %v688_v4 = vsel %vm235_vm5, %v658_v2, 0.0 }
 0x1b0   :  { %255 = vadd.xlane.f32.xlu0 %v254_v17  ;;  %279 = vadd.xlane.f32.xlu1 %v278_v18 }
 0x1b4   :  { %258 = vadd.xlane.f32.xlu0 %v257_v21  ;;  %282 = vadd.xlane.f32.xlu1 %v281_v22 }
 0x1b8   :  { %671 = vadd.xlane.f32.xlu1 %v670_v25  ;;  %668 = vadd.xlane.f32.xlu0 %v667_v26 }
 0x1bc   :  { %695 = vadd.xlane.f32.xlu1 %v694_v29  ;;  %692 = vadd.xlane.f32.xlu0 %v691_v32 }
 0x1c0   :  { %698 = vadd.xlane.f32.xlu1 %v697_v37  ;;  %674 = vadd.xlane.f32.xlu0 %v673_v38 }
 0x1c4   :  { %701 = vadd.xlane.f32.xlu1 %v700_v41  ;;  %677 = vadd.xlane.f32.xlu0 %v676_v42 }
 0x1c8   :  { %704 = vadd.xlane.f32.xlu1 %v703_v47  ;;  %680 = vadd.xlane.f32.xlu0 %v679_v48 }
 0x1cc   :  { %707 = vadd.xlane.f32.xlu1 %v706_v53  ;;  %683 = vadd.xlane.f32.xlu0 %v682_v54 }
 0x1d0   :  { %710 = vadd.xlane.f32.xlu1 %v709_v59  ;;  %686 = vadd.xlane.f32.xlu0 %v685_v60 }
 0x1d4   :  { %713 = vadd.xlane.f32.xlu1 %v712_v3  ;;  %689 = vadd.xlane.f32.xlu0 %v688_v4 }
 0x207   :  { %v436_v5 = vpop.f32.mrf.mxu0 }
 0x208   :  { %v443_v6 = vmul.f32 %v436_v5, %v2521_v30  ;;  %v442_v7 = vmul.f32 %v436_v5, %v2526_v31  ;;  %v451_v62 = vmul.f32 %v436_v5, %v2538_v34  ;;  %v450_v13 = vmul.f32 %v436_v5, %v2533_v33 }
 0x209   :  { %v2275_v10 = vpop.f32.mrf.mxu0  ;;  %v452_v20 = vmul.f32 %v436_v5, %v2558_v44  ;;  %v444_v21 = vmul.f32 %v436_v5, %v2553_v43  ;;  %v453_v24 = vmul.f32 %v436_v5, %v2574_v51  ;;  %v445_v25 = vmul.f32 %v436_v5, %v2569_v50 }
 0x20a   :  { %v461_v11 = vsel %vm235_vm5, %v443_v6, 0.0  ;;  %v458_v12 = vsel %vm235_vm5, %v442_v7, 0.0  ;;  %v485_v18 = vsel %vm235_vm5, %v451_v62, 0.0  ;;  %v482_v19 = vsel %vm235_vm5, %v450_v13, 0.0 }
 0x20b   :  { %v439_v14 = vpop.f32.mrf.mxu0  ;;  %462 = vadd.xlane.f32.xlu1 %v461_v11  ;;  %459 = vadd.xlane.f32.xlu0 %v458_v12  ;;  %v488_v22 = vsel %vm235_vm5, %v452_v20, 0.0  ;;  %v464_v23 = vsel %vm235_vm5, %v444_v21, 0.0  ;;  %v491_v26 = vsel %vm235_vm5, %v453_v24, 0.0  ;;  %v467_v27 = vsel %vm235_vm5, %v445_v25, 0.0 }
 0x20c   :  { %v454_v28 = vmul.f32 %v436_v5, %v2590_v57  ;;  %v446_v29 = vmul.f32 %v436_v5, %v2585_v56  ;;  %v455_v38 = vmul.f32 %v436_v5, %v2608_v0  ;;  %v447_v39 = vmul.f32 %v436_v5, %v2603_v63 }
 0x20d   :  { %v2276_v17 = vpop.f32.mrf.mxu0  ;;  %v456_v46 = vmul.f32 %v436_v5, %v2624_v9  ;;  %v448_v47 = vmul.f32 %v436_v5, %v2619_v8  ;;  %v457_v54 = vmul.f32 %v436_v5, %v2640_v16  ;;  %v449_v55 = vmul.f32 %v436_v5, %v2635_v15 }
 0x20e   :  { %v494_v36 = vsel %vm235_vm5, %v454_v28, 0.0  ;;  %v470_v37 = vsel %vm235_vm5, %v446_v29, 0.0  ;;  %v497_v42 = vsel %vm235_vm5, %v455_v38, 0.0  ;;  %v473_v45 = vsel %vm235_vm5, %v447_v39, 0.0 }
 0x20f   :  { %486 = vadd.xlane.f32.xlu1 %v485_v18  ;;  %483 = vadd.xlane.f32.xlu0 %v482_v19  ;;  %v500_v52 = vsel %vm235_vm5, %v456_v46, 0.0  ;;  %v476_v53 = vsel %vm235_vm5, %v448_v47, 0.0  ;;  %v503_v60 = vsel %vm235_vm5, %v457_v54, 0.0  ;;  %v479_v61 = vsel %vm235_vm5, %v449_v55, 0.0 }
 0x213   :  { %489 = vadd.xlane.f32.xlu1 %v488_v22  ;;  %465 = vadd.xlane.f32.xlu0 %v464_v23 }
 0x217   :  { %v2716_v32 = vpop.f32.mrf.mxu0  ;;  %492 = vadd.xlane.f32.xlu1 %v491_v26  ;;  %468 = vadd.xlane.f32.xlu0 %v467_v27 }
 0x218   :  { %v864_v2 = vmul.f32 %v2716_v32, %v2521_v30  ;;  %v863_v3 = vmul.f32 %v2716_v32, %v2526_v31  ;;  %v872_v10 = vmul.f32 %v2716_v32, %v2538_v34  ;;  %v871_v11 = vmul.f32 %v2716_v32, %v2533_v33 }
 0x219   :  { %v2299_v35 = vpop.f32.mrf.mxu0  ;;  %v873_v13 = vmul.f32 %v2716_v32, %v2558_v44  ;;  %v865_v14 = vmul.f32 %v2716_v32, %v2553_v43  ;;  %v300_v34 = vlaneseq  ;;  %v874_v20 = vmul.f32 %v2716_v32, %v2574_v51 }
 0x21a   :  { %v882_v6 = vsel %vm235_vm5, %v864_v2, 0.0  ;;  %v879_v7 = vsel %vm235_vm5, %v863_v3, 0.0  ;;  %v906_v12 = vsel %vm235_vm5, %v872_v10, 0.0  ;;  %v903_v62 = vsel %vm235_vm5, %v871_v11, 0.0 }
 0x21b   :  { %v860_v40 = vpop.f32.mrf.mxu0  ;;  %495 = vadd.xlane.f32.xlu1 %v494_v36  ;;  %471 = vadd.xlane.f32.xlu0 %v470_v37  ;;  %v909_v18 = vsel %vm235_vm5, %v873_v13, 0.0  ;;  %v885_v19 = vsel %vm235_vm5, %v865_v14, 0.0  ;;  %v866_v44 = vmul.f32 %v2716_v32, %v2569_v50  ;;  %v2774_v43 = vand.u32 127, %v300_v34 }
 0x21c   :  { %v2776_v21 = vshrl.u32 %v300_v34, 7  ;;  %v912_v24 = vsel %vm235_vm5, %v874_v20, 0.0  ;;  %v875_v51 = vmul.f32 %v2716_v32, %v2590_v57  ;;  %v867_v50 = vmul.f32 %v2716_v32, %v2585_v56 }
 0x21d   :  { %v2300_v41 = vpop.f32.mrf.mxu0  ;;  %v888_v25 = vsel %vm235_vm5, %v866_v44, 0.0  ;;  %v876_v36 = vmul.f32 %v2716_v32, %v2608_v0  ;;  %v868_v57 = vmul.f32 %v2716_v32, %v2603_v63  ;;  %v877_v56 = vmul.f32 %v2716_v32, %v2624_v9 }
 0x21e   :  { %v2790_v26 = vsub.s32 %v2774_v43, %v2776_v21  ;;  %v915_v29 = vsel %vm235_vm5, %v875_v51, 0.0  ;;  %v891_v35 = vsel %vm235_vm5, %v867_v50, 0.0  ;;  %v869_v0 = vmul.f32 %v2716_v32, %v2619_v8 }
 0x21f   :  { %498 = vadd.xlane.f32.xlu1 %v497_v42  ;;  %474 = vadd.xlane.f32.xlu0 %v473_v45  ;;  %v918_v8 = vsel %vm235_vm5, %v876_v36, 0.0  ;;  %v894_v46 = vsel %vm235_vm5, %v868_v57, 0.0  ;;  %vm2048_vm4 = vcmp.eq.s32.totalorder %v2774_v43, 8 }
 0x221   :  { %v2726_v48 = vpop.xlane.xlu0 %240  ;;  %v2728_v49 = vpop.xlane.xlu1 %237 }
 0x222   :  { %v309_v37 = vrot.slane %v2726_v48, %v2790_v26  ;;  %v305_v38 = vrot.slane %v2728_v49, %v2790_v26  ;;  %v921_v48 = vsel %vm235_vm5, %v877_v56, 0.0  ;;  %v878_v49 = vmul.f32 %v2716_v32, %v2640_v16 }
 0x223   :  { %501 = vadd.xlane.f32.xlu1 %v500_v52  ;;  %477 = vadd.xlane.f32.xlu0 %v476_v53  ;;  %v870_v52 = vmul.f32 %v2716_v32, %v2635_v15 }
 0x224   :  { %v367_v53 = vsel %vm366_vm6, %v309_v37, %v305_v38  ;;  %v924_v14 = vsel %vm235_vm5, %v878_v49, 0.0 }
 0x225   :  { %v2734_v58 = vpop.xlane.xlu0 %261  ;;  %v2736_v59 = vpop.xlane.xlu1 %264  ;;  %v900_v34 = vsel %vm235_vm5, %v870_v52, 0.0 }
 0x226   :  { %v337_v63 = vrot.slane %v2734_v58, %v2790_v26  ;;  %v341_v39 = vrot.slane %v2736_v59, %v2790_v26  ;;  %v897_v58 = vsel %vm235_vm5, %v869_v0, 0.0 }
 0x227   :  { %504 = vadd.xlane.f32.xlu1 %v503_v60  ;;  %480 = vadd.xlane.f32.xlu0 %v479_v61 }
 0x228   :  { %v380_v59 = vsel %vm366_vm6, %v341_v39, %v337_v63 }
 0x229   :  { %v2744_v4 = vpop.xlane.xlu0 %243  ;;  %v2746_v5 = vpop.xlane.xlu1 %267 }
 0x22a   :  { %v313_v40 = vrot.slane %v2744_v4, %v2790_v26  ;;  %v345_v42 = vrot.slane %v2746_v5, %v2790_v26 }
 0x22b   :  { %883 = vadd.xlane.f32.xlu1 %v882_v6  ;;  %880 = vadd.xlane.f32.xlu0 %v879_v7 }
 0x22c   :  { %v369_v60 = vsel %vm368_vm7, %v313_v40, %v367_v53  ;;  %v381_v2 = vsel %vm368_vm7, %v345_v42, %v380_v59 }
 0x22d   :  { %v2754_v30 = vpop.xlane.xlu0 %246  ;;  %v2756_v31 = vpop.xlane.xlu1 %270 }
 0x22e   :  { %v317_v45 = vrot.slane %v2754_v30, %v2790_v26  ;;  %v349_v47 = vrot.slane %v2756_v31, %v2790_v26 }
 0x22f   :  { %907 = vadd.xlane.f32.xlu1 %v906_v12  ;;  %904 = vadd.xlane.f32.xlu0 %v903_v62 }
 0x230   :  { %v371_v3 = vsel %vm370_vm8, %v317_v45, %v369_v60  ;;  %v382_v6 = vsel %vm370_vm8, %v349_v47, %v381_v2 }
 0x231   :  { %v2764_v33 = vpop.xlane.xlu0 %249  ;;  %v2766_v17 = vpop.xlane.xlu1 %273 }
 0x232   :  { %v321_v54 = vrot.slane %v2764_v33, %v2790_v26  ;;  %v353_v55 = vrot.slane %v2766_v17, %v2790_v26 }
 0x233   :  { %910 = vadd.xlane.f32.xlu1 %v909_v18  ;;  %886 = vadd.xlane.f32.xlu0 %v885_v19 }
 0x234   :  { %v373_v11 = vsel %vm372_vm9, %v321_v54, %v371_v3  ;;  %v383_v30 = vsel %vm372_vm9, %v353_v55, %v382_v6 }
 0x235   :  { %v2778_v22 = vpop.xlane.xlu0 %252  ;;  %v2780_v23 = vpop.xlane.xlu1 %276 }
 0x236   :  { %v325_v16 = vrot.slane %v2778_v22, %v2790_v26  ;;  %v357_v15 = vrot.slane %v2780_v23, %v2790_v26 }
 0x237   :  { %913 = vadd.xlane.f32.xlu1 %v912_v24  ;;  %889 = vadd.xlane.f32.xlu0 %v888_v25 }
 0x238   :  { %v375_v31 = vsel %vm374_vm10, %v325_v16, %v373_v11  ;;  %v384_v12 = vsel %vm374_vm10, %v357_v15, %v383_v30 }
 0x239   :  { %v2792_v27 = vpop.xlane.xlu0 %255  ;;  %v280_v28 = vpop.xlane.xlu1 %279 }
 0x23a   :  { %v329_v4 = vrot.slane %v2792_v27, %v2790_v26  ;;  %v361_v5 = vrot.slane %v280_v28, %v2790_v26 }
 0x23b   :  { %916 = vadd.xlane.f32.xlu1 %v915_v29  ;;  %892 = vadd.xlane.f32.xlu0 %v891_v35 }
 0x23c   :  { %v385_v33 = vsel %vm376_vm11, %v361_v5, %v384_v12  ;;  %v377_v17 = vsel %vm376_vm11, %v329_v4, %v375_v31 }
 0x23d   :  { %v259_v9 = vpop.xlane.xlu0 %258  ;;  %v283_v41 = vpop.xlane.xlu1 %282 }
 0x23e   :  { %v333_v7 = vrot.slane %v259_v9, %v2790_v26  ;;  %v365_v10 = vrot.slane %v283_v41, %v2790_v26 }
 0x23f   :  { %919 = vadd.xlane.f32.xlu1 %v918_v8  ;;  %895 = vadd.xlane.f32.xlu0 %v894_v46 }
 0x240   :  { %v386_v18 = vsel %vm378_vm12, %v365_v10, %v385_v33  ;;  %v379_v19 = vsel %vm378_vm12, %v333_v7, %v377_v17 }
 0x241   :  { %v672_v32 = vpop.xlane.xlu1 %671  ;;  %v669_v61 = vpop.xlane.xlu0 %668  ;;  %v393_v22 = vsel %vm389_vm13, %v386_v18, 0.0  ;;  %v390_v23 = vsel %vm389_vm13, %v379_v19, 0.0 }
 0x242   :  { %v738_v29 = vrot.slane %v672_v32, %v2790_v26  ;;  %v734_v35 = vrot.slane %v669_v61, %v2790_v26 }
 0x243   :  { %922 = vadd.xlane.f32.xlu1 %v921_v48  ;;  %898 = vadd.xlane.f32.xlu0 %v897_v58 }
 0x244   :  { %v795_v41 = vsel %vm366_vm6, %v738_v29, %v734_v35 }
 0x245   :  { %v696_v62 = vpop.xlane.xlu1 %695  ;;  %v693_v13 = vpop.xlane.xlu0 %692 }
 0x246   :  { %v770_v36 = vrot.slane %v696_v62, %v2790_v26  ;;  %v766_v57 = vrot.slane %v693_v13, %v2790_v26 }
 0x247   :  { %925 = vadd.xlane.f32.xlu1 %v924_v14  ;;  %901 = vadd.xlane.f32.xlu0 %v900_v34 }
 0x248   :  { %v802_v42 = vsel %vm366_vm6, %v770_v36, %v766_v57 }
 0x249   :  { %v699_v20 = vpop.xlane.xlu1 %698  ;;  %v675_v44 = vpop.xlane.xlu0 %674 }
 0x24a   :  { %v774_v56 = vrot.slane %v699_v20, %v2790_v26  ;;  %v742_v37 = vrot.slane %v675_v44, %v2790_v26 }
 0x24b   :  { %394 = vadd.xlane.f32.xlu1 %v393_v22  ;;  %391 = vadd.xlane.f32.xlu0 %v390_v23 }
 0x24c   :  { %v803_v46 = vsel %vm368_vm7, %v774_v56, %v802_v42  ;;  %v796_v47 = vsel %vm368_vm7, %v742_v37, %v795_v41 }
 0x24d   :  { %v702_v24 = vpop.xlane.xlu1 %701  ;;  %v678_v25 = vpop.xlane.xlu0 %677 }
 0x24e   :  { %v778_v38 = vrot.slane %v702_v24, %v2790_v26  ;;  %v746_v0 = vrot.slane %v678_v25, %v2790_v26 }
 0x250   :  { %v804_v52 = vsel %vm370_vm8, %v778_v38, %v803_v46  ;;  %v797_v53 = vsel %vm370_vm8, %v746_v0, %v796_v47 }
 0x251   :  { %v705_v51 = vpop.xlane.xlu1 %704  ;;  %v681_v50 = vpop.xlane.xlu0 %680 }
 0x252   :  { %v782_v63 = vrot.slane %v705_v51, %v2790_v26  ;;  %v750_v39 = vrot.slane %v681_v50, %v2790_v26 }
 0x254   :  { %v805_v54 = vsel %vm372_vm9, %v782_v63, %v804_v52  ;;  %v798_v55 = vsel %vm372_vm9, %v750_v39, %v797_v53 }
 0x255   :  { %v708_v27 = vpop.xlane.xlu1 %707  ;;  %v684_v28 = vpop.xlane.xlu0 %683 }
 0x256   :  { %v786_v45 = vrot.slane %v708_v27, %v2790_v26  ;;  %v754_v8 = vrot.slane %v684_v28, %v2790_v26 }
 0x258   :  { %v806_v60 = vsel %vm374_vm10, %v786_v45, %v805_v54  ;;  %v799_v16 = vsel %vm374_vm10, %v754_v8, %v798_v55 }
 0x259   :  { %v711_v40 = vpop.xlane.xlu1 %710  ;;  %v687_v9 = vpop.xlane.xlu0 %686 }
 0x25a   :  { %v790_v48 = vrot.slane %v711_v40, %v2790_v26  ;;  %v758_v49 = vrot.slane %v687_v9, %v2790_v26 }
 0x25c   :  { %v807_v61 = vsel %vm376_vm11, %v790_v48, %v806_v60  ;;  %v800_v2 = vsel %vm376_vm11, %v758_v49, %v799_v16 }
 0x25d   :  { %v714_v58 = vpop.xlane.xlu1 %713  ;;  %v690_v59 = vpop.xlane.xlu0 %689 }
 0x25e   :  { %v794_v15 = vrot.slane %v714_v58, %v2790_v26  ;;  %v762_v32 = vrot.slane %v690_v59, %v2790_v26 }
 0x260   :  { %v808_v3 = vsel %vm378_vm12, %v794_v15, %v807_v61  ;;  %v801_v4 = vsel %vm378_vm12, %v762_v32, %v800_v2 }
 0x261   :  { %v814_v5 = vsel %vm389_vm13, %v808_v3, 0.0  ;;  %v811_v6 = vsel %vm389_vm13, %v801_v4, 0.0 }
 0x262   :  { %815 = vadd.xlane.f32.xlu1 %v814_v5  ;;  %812 = vadd.xlane.f32.xlu0 %v811_v6 }
 0x294   :  { %v463_v7 = vpop.xlane.xlu1 %462  ;;  %v460_v10 = vpop.xlane.xlu0 %459 }
 0x295   :  { %v529_v18 = vrot.slane %v463_v7, %v2790_v26  ;;  %v525_v19 = vrot.slane %v460_v10, %v2790_v26 }
 0x297   :  { %v586_v29 = vsel %vm366_vm6, %v529_v18, %v525_v19 }
 0x298   :  { %v487_v11 = vpop.xlane.xlu1 %486  ;;  %v484_v30 = vpop.xlane.xlu0 %483 }
 0x299   :  { %v561_v20 = vrot.slane %v487_v11, %v2790_v26  ;;  %v557_v44 = vrot.slane %v484_v30, %v2790_v26 }
 0x29b   :  { %v593_v35 = vsel %vm366_vm6, %v561_v20, %v557_v44 }
 0x29c   :  { %v490_v31 = vpop.xlane.xlu1 %489  ;;  %v466_v12 = vpop.xlane.xlu0 %465 }
 0x29d   :  { %v565_v22 = vrot.slane %v490_v31, %v2790_v26  ;;  %v533_v23 = vrot.slane %v466_v12, %v2790_v26 }
 0x29f   :  { %v594_v56 = vsel %vm368_vm7, %v565_v22, %v593_v35  ;;  %v587_v37 = vsel %vm368_vm7, %v533_v23, %v586_v29 }
 0x2a0   :  { %v493_v62 = vpop.xlane.xlu1 %492  ;;  %v469_v13 = vpop.xlane.xlu0 %468 }
 0x2a1   :  { %v569_v24 = vrot.slane %v493_v62, %v2790_v26  ;;  %v537_v25 = vrot.slane %v469_v13, %v2790_v26 }
 0x2a3   :  { %v595_v63 = vsel %vm370_vm8, %v569_v24, %v594_v56  ;;  %v588_v39 = vsel %vm370_vm8, %v537_v25, %v587_v37 }
 0x2a4   :  { %v496_v14 = vpop.xlane.xlu1 %495  ;;  %v472_v34 = vpop.xlane.xlu0 %471 }
 0x2a5   :  { %v573_v51 = vrot.slane %v496_v14, %v2790_v26  ;;  %v541_v50 = vrot.slane %v472_v34, %v2790_v26 }
 0x2a7   :  { %v596_v40 = vsel %vm372_vm9, %v573_v51, %v595_v63  ;;  %v589_v9 = vsel %vm372_vm9, %v541_v50, %v588_v39 }
 0x2a8   :  { %v499_v33 = vpop.xlane.xlu1 %498  ;;  %v475_v17 = vpop.xlane.xlu0 %474 }
 0x2a9   :  { %v577_v36 = vrot.slane %v499_v33, %v2790_v26  ;;  %v545_v57 = vrot.slane %v475_v17, %v2790_v26 }
 0x2ab   :  { %v597_v45 = vsel %vm374_vm10, %v577_v36, %v596_v40  ;;  %v590_v8 = vsel %vm374_vm10, %v545_v57, %v589_v9 }
 0x2ac   :  { %v502_v27 = vpop.xlane.xlu1 %501  ;;  %v478_v28 = vpop.xlane.xlu0 %477 }
 0x2ad   :  { %v581_v38 = vrot.slane %v502_v27, %v2790_v26  ;;  %v549_v0 = vrot.slane %v478_v28, %v2790_v26 }
 0x2af   :  { %v598_v48 = vsel %vm376_vm11, %v581_v38, %v597_v45  ;;  %v591_v49 = vsel %vm376_vm11, %v549_v0, %v590_v8  ;;  %v1059_v45 = vld [vmem:[%s3226_s6 + $0x20] sm:$0xff]  ;;  %v1056_v8 = vld [vmem:[%s3226_s6 + $0x8] sm:$0xff] }
 0x2b0   :  { %v505_v41 = vpop.xlane.xlu1 %504  ;;  %v481_v42 = vpop.xlane.xlu0 %480 }
 0x2b1   :  { %v585_v46 = vrot.slane %v505_v41, %v2790_v26  ;;  %v553_v47 = vrot.slane %v481_v42, %v2790_v26  ;;  %v1041_v41 = vld [vmem:[%s3225_s5 + $0x8] sm:$0xff]  ;;  %v1055_v42 = vld [vmem:[%s3226_s6] sm:$0xff] }
 0x2b3   :  { %v599_v52 = vsel %vm378_vm12, %v585_v46, %v598_v48  ;;  %v592_v53 = vsel %vm378_vm12, %v553_v47, %v591_v49  ;;  %v2068_v46 = vcombine.low %v1055_v42, %v1059_v45  ;;  %v2069_v47 = vcombine.high %v1055_v42, %v1059_v45  ;;  %v1060_v48 = vld [vmem:[%s3226_s6 + $0x28] sm:$0xff] }
 0x2b4   :  { %v884_v54 = vpop.xlane.xlu1 %883  ;;  %v881_v55 = vpop.xlane.xlu0 %880  ;;  %v605_v58 = vsel %vm389_vm13, %v599_v52, 0.0  ;;  %v602_v59 = vsel %vm389_vm13, %v592_v53, 0.0  ;;  %v2070_v49 = vcombine.low %v1056_v8, %v1060_v48  ;;  %v2071_v52 = vcombine.high %v1056_v8, %v1060_v48  ;;  %v1057_v53 = vld [vmem:[%s3226_s6 + $0x10] sm:$0xff]  ;;  %v2344_v42 = vld [vmem:[%s3227_s8 + $0x48] sm:$0xff]   ;;  %v2349_v48 = vld [vmem:[%s3227_s8 + $0xc0] sm:$0xff]  }
 0x2b5   :  { %606 = vadd.xlane.f32.xlu1 %v605_v58  ;;  %603 = vadd.xlane.f32.xlu0 %v602_v59  ;;  %v950_v7 = vrot.slane %v884_v54, %v2790_v26  ;;  %v946_v10 = vrot.slane %v881_v55, %v2790_v26  ;;  %v1061_v54 = vld [vmem:[%s3226_s6 + $0x30] sm:$0xff]  ;;  %v1058_v55 = vld [vmem:[%s3226_s6 + $0x18] sm:$0xff]  ;;  %v2345_v45 = vld [vmem:[%s3227_s8 + $0xc8] sm:$0xff]  }
 0x2b6   :  { %1179 = vmatprep.subr.bf16.mxu1 %v2069_v47  ;;  %1220 = vmatprep.subr.bf16.mxu0 %v2071_v52  ;;  %v2072_v58 = vcombine.low %v1057_v53, %v1061_v54  ;;  %v2073_v59 = vcombine.high %v1057_v53, %v1061_v54  ;;  %v2346_v8 = vld [vmem:[%s3227_s8 + $0x8] sm:$0xff]   ;;  %v2348_v47 = vld [vmem:[%s3227_s8 + $0x40] sm:$0xff]   ;;  %v2352_v53 = vld [vmem:[%s3227_s8 + $0x178] sm:$0xff]  }
 0x2b7   :  { %v1007_v18 = vsel %vm366_vm6, %v950_v7, %v946_v10  ;;  %1180 = vmatpush1.bf16.msra.mxu1 %v2068_v46  ;;  %1221 = vmatpush1.bf16.msra.mxu0 %v2070_v49  ;;  %v2347_v46 = vld [vmem:[%s3227_s8 + $0x88] sm:$0xff]   ;;  %v2350_v49 = vld [vmem:[%s3227_s8] sm:$0xff]   ;;  %v2353_v54 = vld [vmem:[%s3227_s8 + $0x1f8] sm:$0xff]  }
 0x2b8   :  { %v908_v60 = vpop.xlane.xlu1 %907  ;;  %v905_v16 = vpop.xlane.xlu0 %904  ;;  %1261 = vmatprep.subr.bf16.mxu1 %v2073_v59  ;;  %v2351_v52 = vld [vmem:[%s3227_s8 + $0x80] sm:$0xff]  }
 0x2b9   :  { %v982_v11 = vrot.slane %v908_v60, %v2790_v26  ;;  %v978_v30 = vrot.slane %v905_v16, %v2790_v26  ;;  %v1062_v60 = vld [vmem:[%s3226_s6 + $0x38] sm:$0xff]  ;;  %v3098_v59 = vld [vmem:[%s3228_s7] sm:$0xff]  ;;  %s2394_s6 = smov 127  }
 0x2ba   :  { %v2074_v16 = vcombine.low %v1058_v55, %v1062_v60 }
 0x2bb   :  { %v1014_v19 = vsel %vm366_vm6, %v982_v11, %v978_v30 }
 0x2bc   :  { %v911_v15 = vpop.xlane.xlu1 %910  ;;  %v887_v32 = vpop.xlane.xlu0 %886 }
 0x2bd   :  { %v986_v31 = vrot.slane %v911_v15, %v2790_v26  ;;  %v954_v12 = vrot.slane %v887_v32, %v2790_v26  ;;  %v2075_v15 = vcombine.high %v1058_v55, %v1062_v60  ;;  %v1067_v55 = vsub.s32 0, %v2776_v21 }
 0x2be   :  { %v1071_v60 = vsub.s32 1, %v2776_v21 }
 0x2bf   :  { %v1015_v22 = vsel %vm368_vm7, %v986_v31, %v1014_v19  ;;  %v1008_v23 = vsel %vm368_vm7, %v954_v12, %v1007_v18  ;;  %1302 = vmatprep.subr.bf16.mxu0 %v2075_v15  ;;  %v1068_v15 = vrot.slane %v3098_v59, %v1067_v55  ;;  %v2375_v55 = vld [vmem:[%s3227_s8 + $0x190] sm:$0xff]  }
 0x2c0   :  { %v914_v61 = vpop.xlane.xlu1 %913  ;;  %v890_v2 = vpop.xlane.xlu0 %889 }
 0x2c1   :  { %v990_v62 = vrot.slane %v914_v61, %v2790_v26  ;;  %v958_v13 = vrot.slane %v890_v2, %v2790_v26 }
 0x2c3   :  { %v1016_v51 = vsel %vm370_vm8, %v990_v62, %v1015_v22  ;;  %v1009_v50 = vsel %vm370_vm8, %v958_v13, %v1008_v23  ;;  %v2321_v22 = vld [vmem:[%s3227_s8 + $0xf8] sm:$0xff]  }
 0x2c4   :  { %v917_v3 = vpop.xlane.xlu1 %916  ;;  %v893_v4 = vpop.xlane.xlu0 %892  ;;  %v2322_v23 = vld [vmem:[%s3227_s8 + $0x38] sm:$0xff]  }
 0x2c5   :  { %v994_v14 = vrot.slane %v917_v3, %v2790_v26  ;;  %v962_v34 = vrot.slane %v893_v4, %v2790_v26 }
 0x2c7   :  { %v1017_v27 = vsel %vm372_vm9, %v994_v14, %v1016_v51  ;;  %v1010_v28 = vsel %vm372_vm9, %v962_v34, %v1009_v50  ;;  %v2325_v51 = vld [vmem:[%s3227_s8 + $0xf0] sm:$0xff]  }
 0x2c8   :  { %v920_v5 = vpop.xlane.xlu1 %919  ;;  %v896_v6 = vpop.xlane.xlu0 %895  ;;  %v2327_v50 = vld [vmem:[%s3227_s8 + $0xb0] sm:$0xff]  }
 0x2c9   :  { %v998_v20 = vrot.slane %v920_v5, %v2790_v26  ;;  %v966_v44 = vrot.slane %v896_v6, %v2790_v26 }
 0x2cb   :  { %v1018_v36 = vsel %vm374_vm10, %v998_v20, %v1017_v27  ;;  %v1011_v57 = vsel %vm374_vm10, %v966_v44, %v1010_v28  ;;  %v2320_v44 = vld [vmem:[%s3227_s8 + $0x78] sm:$0xff]   ;;  %v2328_v27 = vld [vmem:[%s3227_s8 + $0x68] sm:$0xff]  }
 0x2cc   :  { %v923_v33 = vpop.xlane.xlu1 %922  ;;  %v899_v17 = vpop.xlane.xlu0 %898  ;;  %v2329_v28 = vld [vmem:[%s3227_s8 + $0xe8] sm:$0xff]  }
 0x2cd   :  { %v1002_v24 = vrot.slane %v923_v33, %v2790_v26  ;;  %v970_v25 = vrot.slane %v899_v17, %v2790_v26 }
 0x2cf   :  { %v1019_v38 = vsel %vm376_vm11, %v1002_v24, %v1018_v36  ;;  %v1012_v0 = vsel %vm376_vm11, %v970_v25, %v1011_v57  ;;  %v2323_v24 = vld [vmem:[%s3227_s8 + $0xb8] sm:$0xff]   ;;  %v2324_v25 = vld [vmem:[%s3227_s8 + $0x70] sm:$0xff]   ;;  %v2332_v36 = vld [vmem:[%s3227_s8 + $0x60] sm:$0xff]  }
 0x2d0   :  { %v926_v29 = vpop.xlane.xlu1 %925  ;;  %v902_v35 = vpop.xlane.xlu0 %901  ;;  %v2333_v57 = vld [vmem:[%s3227_s8 + $0xe0] sm:$0xff]  }
 0x2d1   :  { %v1006_v56 = vrot.slane %v926_v29, %v2790_v26  ;;  %v974_v37 = vrot.slane %v902_v35, %v2790_v26  ;;  %v1040_v26 = vld [vmem:[%s3225_s5] sm:$0xff]  ;;  %v2330_v29 = vld [vmem:[%s3227_s8 + $0x28] sm:$0xff]  }
 0x2d2   :  { %v2331_v35 = vld [vmem:[%s3227_s8 + $0xa8] sm:$0xff]  }
 0x2d3   :  { %v1020_v63 = vsel %vm378_vm12, %v1006_v56, %v1019_v38  ;;  %v1013_v39 = vsel %vm378_vm12, %v974_v37, %v1012_v0  ;;  %v2334_v56 = vld [vmem:[%s3227_s8 + $0x20] sm:$0xff]   ;;  %v2336_v38 = vld [vmem:[%s3227_s8 + $0x58] sm:$0xff]  }
 0x2d4   :  { %v1026_v40 = vsel %vm389_vm13, %v1020_v63, 0.0  ;;  %v1023_v9 = vsel %vm389_vm13, %v1013_v39, 0.0  ;;  %v395_v32 = vpop.xlane.xlu1 %394  ;;  %v392_v61 = vpop.xlane.xlu0 %391  ;;  %v2335_v37 = vld [vmem:[%s3227_s8 + $0xa0] sm:$0xff]   ;;  %v2337_v0 = vld [vmem:[%s3227_s8 + $0xd8] sm:$0xff]  }
 0x2d5   :  { %1027 = vadd.xlane.f32.xlu1 %v1026_v40  ;;  %1024 = vadd.xlane.f32.xlu0 %v1023_v9  ;;  %v2338_v63 = vld [vmem:[%s3227_s8 + $0x18] sm:$0xff]   ;;  %v2340_v40 = vld [vmem:[%s3227_s8 + $0x50] sm:$0xff]  }
 0x2d6   :  { %v2339_v39 = vld [vmem:[%s3227_s8 + $0x98] sm:$0xff]   ;;  %v2341_v9 = vld [vmem:[%s3227_s8 + $0xd0] sm:$0xff]  }
 0x2e6   :  { %1049 = vperm.xlu1 %2309, %v1041_v41   ;;  %v2342_v41 = vld [vmem:[%s3227_s8 + $0x10] sm:$0xff]  }
 0x2eb   :  { %1044 = vperm.xlu0 %2308, %v1040_v26   ;;  %v816_v2 = vpop.xlane.xlu1 %815  ;;  %v813_v3 = vpop.xlane.xlu0 %812  ;;  %v2343_v26 = vld [vmem:[%s3227_s8 + $0x90] sm:$0xff]  }
 0x33e   :  { %v607_v4 = vpop.xlane.xlu1 %606  ;;  %v604_v5 = vpop.xlane.xlu0 %603 }
 0x33f   :  { %v1031_v6 = vsel %vm1029_vm14, %v395_v32, %v607_v4  ;;  %v1030_v7 = vsel %vm1029_vm14, %v392_v61, %v604_v5  ;;  %v1072_v61 = vrot.slane %v3098_v59, %v1071_v60  ;;  %v1091_v60 = vsub.s32 6, %v2776_v21 }
 0x340   :  { %v1034_v11 = vsel %vm1032_vm15, %v1031_v6, %v816_v2  ;;  %v1033_v12 = vsel %vm1032_vm15, %v1030_v7, %v813_v3 }
 0x35e   :  { %v1028_v10 = vpop.xlane.xlu1 %1027  ;;  %v1025_v30 = vpop.xlane.xlu0 %1024 }
 0x35f   :  { %v1037_v31 = vsel %vm1035_vm0, %v1034_v11, %v1028_v10  ;;  %v1036_v62 = vsel %vm1035_vm0, %v1033_v12, %v1025_v30  ;;  %v1095_v12 = vsub.s32 7, %v2776_v21 }
 0x360   :  { %v1039_v13 = vmul.f32 0.0625, %v1037_v31  ;;  %v1038_v34 = vmul.f32 0.0625, %v1036_v62  ;;  %v1087_v31 = vsub.s32 5, %v2776_v21 }
 0x362   :  { %v1050_v14 = vpop.permute.xlu1 %1049 }
 0x363   :  { %v1053_v17 = vadd.f32 %v1050_v14, %v1039_v13 }
 0x366   :  { %v1045_v33 = vpop.permute.xlu0 %1044 }
 0x367   :  { %v1052_v18 = vadd.f32 %v1045_v33, %v1038_v34  ;;  %v2354_v33 = vld [vmem:[%s3227_s8 + $0x138] sm:$0xff]  }
 0x369   :  { %v1054_v19 = vpack.c.bf16 %v1053_v17, %v1052_v18  ;;  %v2355_v17 = vld [vmem:[%s3227_s8 + $0x1b8] sm:$0xff]  }
 0x36b   :  { %1105 = vxpose.xlu1.c.b16.start.end [1/1] (short) (narrow) %v1054_v19, 16 }
 0x3cd   :  { %v1113_v20 = vpop.trf.xlu1 }
 0x3ce   :  { %2076 = vmatmul.mubr.msk.bf16.vlgmr.msra.gmra.mxu1 %vm1161_vm1, %v1113_v20  ;;  %2077 = vmatmul.mubr.msk.bf16.vlgmr.msra.gmra.mxu0 %vm1161_vm1, %v1113_v20 }
 0x3cf   :  { %1262 = vmatpush1.bf16.msra.mxu1 %v2072_v58  ;;  %1303 = vmatpush1.bf16.msra.mxu0 %v2074_v16  ;;  %v1075_v58 = vsub.s32 2, %v2776_v21  ;;  %v1079_v16 = vsub.s32 3, %v2776_v21 }
 0x3d0   :  { %1279 = vmatprep.mubr.bf16.mxu1 %v2388_v1  ;;  %1320 = vmatprep.mubr.bf16.mxu0 %v2388_v1  ;;  %v2326_v1 = vld [vmem:[%s3227_s8 + $0x30] sm:$0xff]  }
 0x3d1   :  { %2165 = vmatprep.subr.bf16.mxu1 %v2320_v44  ;;  %2187 = vmatprep.subr.bf16.mxu0 %v2321_v22  ;;  %v1076_v32 = vrot.slane %v3098_v59, %v1075_v58  ;;  %v1080_v2 = vrot.slane %v3098_v59, %v1079_v16  ;;  %v2356_v22 = vld [vmem:[%s3227_s8 + $0x170] sm:$0xff]   ;;  %v1083_v58 = vsub.s32 4, %v2776_v21  ;;  %v2376_v16 = vld [vmem:[%s3227_s8 + $0x148] sm:$0xff]  }
 0x3d2   :  { %v2379_v21 = vld [vmem:[%s3227_s8 + $0x188] sm:$0xff]  }
 0x3d6   :  { %2078 = vmatmul.mubr.msk.bf16.vlgmr.msra.gmra.mxu1 %vm1161_vm1, %v1113_v20  ;;  %2079 = vmatmul.mubr.msk.bf16.vlgmr.msra.gmra.mxu0 %vm1161_vm1, %v1113_v20 }
 0x3d7   :  { %2166 = vmatpush3.bf16.msra.mxu1 %v2322_v23  ;;  %2188 = vmatpush3.bf16.msra.mxu0 %v2323_v24  ;;  %v2357_v23 = vld [vmem:[%s3227_s8 + $0x1f0] sm:$0xff]   ;;  %v1088_v24 = vrot.slane %v3098_v59, %v1087_v31 }
 0x3d8   :  { %2167 = vmatprep.subr.bf16.mxu1 %v2324_v25  ;;  %2189 = vmatprep.subr.bf16.mxu0 %v2325_v51  ;;  %v1096_v25 = vrot.slane %v3098_v59, %v1095_v12 }
 0x3db   :  { %2168 = vmatpush3.bf16.msra.mxu1 %v2326_v1  ;;  %2190 = vmatpush3.bf16.msra.mxu0 %v2327_v50  ;;  %v2358_v50 = vld [vmem:[%s3227_s8 + $0x130] sm:$0xff]  }
 0x3dc   :  { %2169 = vmatprep.subr.bf16.mxu1 %v2328_v27  ;;  %2191 = vmatprep.subr.bf16.mxu0 %v2329_v28  ;;  %v2359_v27 = vld [vmem:[%s3227_s8 + $0x1b0] sm:$0xff]  }
 0x3df   :  { %2170 = vmatpush3.bf16.msra.mxu1 %v2330_v29  ;;  %2192 = vmatpush3.bf16.msra.mxu0 %v2331_v35  ;;  %v2360_v35 = vld [vmem:[%s3227_s8 + $0x168] sm:$0xff]  }
 0x3e0   :  { %2171 = vmatprep.subr.bf16.mxu1 %v2332_v36  ;;  %2193 = vmatprep.subr.bf16.mxu0 %v2333_v57  ;;  %v2361_v36 = vld [vmem:[%s3227_s8 + $0x1e8] sm:$0xff]  }
 0x3e3   :  { %2172 = vmatpush3.bf16.msra.mxu1 %v2334_v56  ;;  %2194 = vmatpush3.bf16.msra.mxu0 %v2335_v37 }
 0x3e4   :  { %2173 = vmatprep.subr.bf16.mxu1 %v2336_v38  ;;  %2195 = vmatprep.subr.bf16.mxu0 %v2337_v0 }
 0x3e7   :  { %2174 = vmatpush3.bf16.msra.mxu1 %v2338_v63  ;;  %2196 = vmatpush3.bf16.msra.mxu0 %v2339_v39  ;;  %v2362_v39 = vld [vmem:[%s3227_s8 + $0x128] sm:$0xff]  }
 0x3e8   :  { %2175 = vmatprep.subr.bf16.mxu1 %v2340_v40  ;;  %2197 = vmatprep.subr.bf16.mxu0 %v2341_v9  ;;  %v2363_v40 = vld [vmem:[%s3227_s8 + $0x1a8] sm:$0xff]  }
 0x3eb   :  { %2176 = vmatpush3.bf16.msra.mxu1 %v2342_v41  ;;  %2198 = vmatpush3.bf16.msra.mxu0 %v2343_v26  ;;  %v2364_v26 = vld [vmem:[%s3227_s8 + $0x160] sm:$0xff]  }
 0x3ec   :  { %2177 = vmatprep.subr.bf16.mxu1 %v2344_v42  ;;  %2199 = vmatprep.subr.bf16.mxu0 %v2345_v45  ;;  %v2365_v42 = vld [vmem:[%s3227_s8 + $0x1e0] sm:$0xff]  }
 0x3ed   :  { %v2366_v45 = vld [vmem:[%s3227_s8 + $0x120] sm:$0xff]  }
 0x3ef   :  { %2178 = vmatpush3.bf16.msra.mxu1 %v2346_v8  ;;  %2200 = vmatpush3.bf16.msra.mxu0 %v2347_v46  ;;  %v2367_v8 = vld [vmem:[%s3227_s8 + $0x1a0] sm:$0xff]   ;;  %v2368_v46 = vld [vmem:[%s3227_s8 + $0x158] sm:$0xff]  }
 0x3f0   :  { %2179 = vmatprep.subr.bf16.mxu1 %v2348_v47  ;;  %2201 = vmatprep.subr.bf16.mxu0 %v2349_v48  ;;  %v2369_v47 = vld [vmem:[%s3227_s8 + $0x1d8] sm:$0xff]  }
 0x3f1   :  { %v2370_v48 = vld [vmem:[%s3227_s8 + $0x118] sm:$0xff]  }
 0x3f3   :  { %2180 = vmatpush3.bf16.msra.mxu1 %v2350_v49  ;;  %2202 = vmatpush3.bf16.msra.mxu0 %v2351_v52  ;;  %v2371_v49 = vld [vmem:[%s3227_s8 + $0x198] sm:$0xff]   ;;  %v2372_v52 = vld [vmem:[%s3227_s8 + $0x150] sm:$0xff]  }
 0x3f4   :  { %2209 = vmatprep.subr.bf16.mxu1 %v2352_v53  ;;  %2231 = vmatprep.subr.bf16.mxu0 %v2353_v54  ;;  %v2373_v53 = vld [vmem:[%s3227_s8 + $0x1d0] sm:$0xff]  }
 0x3f5   :  { %v2374_v54 = vld [vmem:[%s3227_s8 + $0x110] sm:$0xff]  }
 0x48e   :  { %v1199_v3 = vpop.f32.mrf.mxu1  ;;  %v1240_v4 = vpop.f32.mrf.mxu0 }
 0x48f   :  { %v1200_v5 = vadd.f32 %v1199_v3, %v1068_v15  ;;  %v1241_v6 = vadd.f32 %v1240_v4, %v1076_v32  ;;  %v2377_v15 = vld [vmem:[%s3227_s8 + $0x1c8] sm:$0xff]   ;;  %v2380_v3 = vld [vmem:[%s3227_s8 + $0x140] sm:$0xff]  }
 0x490   :  { %v1201_v7 = vpop.f32.mrf.mxu1  ;;  %v1242_v10 = vpop.f32.mrf.mxu0  ;;  %v2378_v32 = vld [vmem:[%s3227_s8 + $0x108] sm:$0xff]   ;;  %v2381_v4 = vld [vmem:[%s3227_s8 + $0x1c0] sm:$0xff]  }
 0x491   :  { %v1202_v11 = vadd.f32 %v1201_v7, %v1072_v61  ;;  %v1243_v30 = vadd.f32 %v1242_v10, %v1080_v2  ;;  %v1329_v18 = vpack.c.bf16 %v1200_v5, %v1200_v5  ;;  %v1331_v19 = vpack.c.bf16 %v1241_v6, %v1241_v6  ;;  %v2382_v5 = vld [vmem:[%s3227_s8 + $0x100] sm:$0xff]  }
 0x492   :  { %v1203_v62 = vpop.f32.mrf.mxu1  ;;  %v1244_v13 = vpop.f32.mrf.mxu0  ;;  %v1084_v61 = vrot.slane %v3098_v59, %v1083_v58  ;;  %v1092_v2 = vrot.slane %v3098_v59, %v1091_v60  ;;  %v2383_v59 = vld [vmem:[%s3227_s8 + $0x180] sm:$0xff]  }
 0x493   :  { %v1330_v14 = vpack.c.bf16 %v1202_v11, %v1202_v11  ;;  %v1332_v34 = vpack.c.bf16 %v1243_v30, %v1243_v30 }
 0x494   :  { %v1204_v20 = vpop.f32.mrf.mxu1  ;;  %v1245_v44 = vpop.f32.mrf.mxu0 }
 0x495   :  { %1888 = vmatprep.mubr.bf16.mxu1 %v1330_v14  ;;  %1928 = vmatprep.mubr.bf16.mxu0 %v1332_v34 }
 0x496   :  { %v3122_v51 = vpop.f32.mrf.mxu1  ;;  %v3124_v1 = vpop.f32.mrf.mxu0  ;;  %1889 = vmatmul.mubr.bf16.vlgmr.msra.gmra.mxu1 %v1329_v18  ;;  %1929 = vmatmul.mubr.bf16.vlgmr.msra.gmra.mxu0 %v1331_v19  ;;  %v2080_v18 = vld [vmem:[%s3229_s9] ss:$0 sm:$0xff] }
 0x497   :  { %2210 = vmatpush3.bf16.msra.mxu1 %v2354_v33  ;;  %2232 = vmatpush3.bf16.msra.mxu0 %v2355_v17  ;;  %v1282_v6 = vadd.f32 %v3122_v51, %v1084_v61  ;;  %v1323_v7 = vadd.f32 %v3124_v1, %v1092_v2 }
 0x498   :  { %v1283_v28 = vpop.f32.mrf.mxu1  ;;  %v1324_v29 = vpop.f32.mrf.mxu0  ;;  %2211 = vmatprep.subr.bf16.mxu1 %v2356_v22  ;;  %2233 = vmatprep.subr.bf16.mxu0 %v2357_v23 }
 0x499   :  { %v1284_v57 = vadd.f32 %v1283_v28, %v1088_v24  ;;  %v1325_v56 = vadd.f32 %v1324_v29, %v1096_v25  ;;  %v1333_v10 = vpack.c.bf16 %v1282_v6, %v1282_v6  ;;  %v1335_v11 = vpack.c.bf16 %v1323_v7, %v1323_v7 }
 0x49a   :  { %v1285_v37 = vpop.f32.mrf.mxu1  ;;  %v1326_v38 = vpop.f32.mrf.mxu0 }
 0x49b   :  { %v1334_v0 = vpack.c.bf16 %v1284_v57, %v1284_v57  ;;  %v1336_v63 = vpack.c.bf16 %v1325_v56, %v1325_v56  ;;  %2212 = vmatpush3.bf16.msra.mxu1 %v2358_v50  ;;  %2234 = vmatpush3.bf16.msra.mxu0 %v2359_v27  ;;  %v2034_v56 = vld [vmem:[%s3230_s10] sm:$0xf] }
 0x49c   :  { %v1286_v9 = vpop.f32.mrf.mxu1  ;;  %v1327_v41 = vpop.f32.mrf.mxu0  ;;  %2213 = vmatprep.subr.bf16.mxu1 %v2360_v35  ;;  %2235 = vmatprep.subr.bf16.mxu0 %v2361_v36 }
 0x49d   :  { %1968 = vmatprep.mubr.bf16.mxu1 %v1334_v0  ;;  %2008 = vmatprep.mubr.bf16.mxu0 %v1336_v63 }
 0x49f   :  { %2214 = vmatpush3.bf16.msra.mxu1 %v2362_v39  ;;  %2236 = vmatpush3.bf16.msra.mxu0 %v2363_v40 }
 0x4a0   :  { %2215 = vmatprep.subr.bf16.mxu1 %v2364_v26  ;;  %2237 = vmatprep.subr.bf16.mxu0 %v2365_v42 }
 0x4a3   :  { %2216 = vmatpush3.bf16.msra.mxu1 %v2366_v45  ;;  %2238 = vmatpush3.bf16.msra.mxu0 %v2367_v8 }
 0x4a4   :  { %2217 = vmatprep.subr.bf16.mxu1 %v2368_v46  ;;  %2239 = vmatprep.subr.bf16.mxu0 %v2369_v47 }
 0x4a7   :  { %2218 = vmatpush3.bf16.msra.mxu1 %v2370_v48  ;;  %2240 = vmatpush3.bf16.msra.mxu0 %v2371_v49 }
 0x4a8   :  { %2219 = vmatprep.subr.bf16.mxu1 %v2372_v52  ;;  %2241 = vmatprep.subr.bf16.mxu0 %v2373_v53 }
 0x4ab   :  { %2220 = vmatpush3.bf16.msra.mxu1 %v2374_v54  ;;  %2242 = vmatpush3.bf16.msra.mxu0 %v2375_v55 }
 0x4ac   :  { %2221 = vmatprep.subr.bf16.mxu1 %v2376_v16  ;;  %2243 = vmatprep.subr.bf16.mxu0 %v2377_v15 }
 0x4af   :  { %2222 = vmatpush3.bf16.msra.mxu1 %v2378_v32  ;;  %2244 = vmatpush3.bf16.msra.mxu0 %v2379_v21 }
 0x4b0   :  { %2223 = vmatprep.subr.bf16.mxu1 %v2380_v3  ;;  %2245 = vmatprep.subr.bf16.mxu0 %v2381_v4 }
 0x4b3   :  { %2224 = vmatpush3.bf16.msra.mxu1 %v2382_v5  ;;  %2246 = vmatpush3.bf16.msra.mxu0 %v2383_v59 }
 0x4b6   :  { %1969 = vmatmul.mubr.bf16.vlgmr.msra.gmra.mxu1 %v1333_v10  ;;  %2009 = vmatmul.mubr.bf16.vlgmr.msra.gmra.mxu0 %v1335_v11 }
 0x556   :  { %v2181_v30 = vpop.f32.mrf.mxu1  ;;  %v2203_v31 = vpop.f32.mrf.mxu0 }
 0x558   :  { %v2182_v12 = vpop.f32.mrf.mxu1  ;;  %v2204_v62 = vpop.f32.mrf.mxu0 }
 0x559   :  { %v2183_v17 = vadd.f32 %v2182_v12, %v2181_v30  ;;  %v2205_v22 = vadd.f32 %v2204_v62, %v2203_v31 }
 0x55a   :  { %v2184_v13 = vpop.f32.mrf.mxu1  ;;  %v2206_v14 = vpop.f32.mrf.mxu0 }
 0x55b   :  { %v1891_v19 = vadd.f32 %v2183_v17, %v2080_v18 }
 0x55c   :  { %v2185_v34 = vpop.f32.mrf.mxu1  ;;  %v2207_v33 = vpop.f32.mrf.mxu0 }
 0x55d   :  { %v1931_v25 = vadd.f32 %v2205_v22, %v1891_v19 }
 0x576   :  { %v2225_v20 = vpop.f32.mrf.mxu1  ;;  %v2247_v44 = vpop.f32.mrf.mxu0 }
 0x578   :  { %v2226_v23 = vpop.f32.mrf.mxu1  ;;  %v2248_v24 = vpop.f32.mrf.mxu0 }
 0x579   :  { %v2227_v51 = vadd.f32 %v2226_v23, %v2225_v20  ;;  %v2249_v28 = vadd.f32 %v2248_v24, %v2247_v44 }
 0x57a   :  { %v2228_v1 = vpop.f32.mrf.mxu1  ;;  %v2250_v50 = vpop.f32.mrf.mxu0 }
 0x57b   :  { %v1971_v27 = vadd.f32 %v2227_v51, %v1931_v25 }
 0x57c   :  { %v2229_v29 = vpop.f32.mrf.mxu1  ;;  %v2251_v35 = vpop.f32.mrf.mxu0 }
 0x57d   :  { %v2011_v36 = vadd.f32 %v2249_v28, %v1971_v27 }
 0x57f   :  { %v2017_v57 = vsel %vm2016_vm2, %v2011_v36, -inf }
 0x580   :  { %2018 = vmax.xlane.f32.xlu0 %v2017_v57 }
 0x596   :  { %2036 = vrot.lane.b32.xlu0 %v2034_v56, %s2393_s18 }
 0x609   :  { %v2019_v37 = vpop.xlane.xlu0 %2018 }
 0x60a   :  { %v2020_v38 = vsub.f32 %v2011_v36, %v2019_v37 }
 0x60c   :  { %v2021_v0 = vmul.f32 1.442695, %v2020_v38 }
 0x60d   :  { %v2037_v39 = vpop.permute.xlu0 %2036 }
 0x60e   :  { %2384 = vpow2.f32 %v2021_v0  ;;  %v2039_v40 = vmul.f32 %v2037_v39, %v2011_v36 }
 0x61b   :  { %v2385_v63 = vpop.eup %2384 }
 0x61c   :  { %2024 = vrot.lane.b32.xlu1 %v2385_v63, %s2394_s6 }
 0x620   :  { %2041 = vrot.lane.b32.xlu1 %v2039_v40, %s2394_s6 }
 0x68e   :  { %v2025_v9 = vpop.permute.xlu1 %2024 }
 0x68f   :  { %v2028_v41 = vsel %vm2027_vm3, %v2025_v9, 0.0 }
 0x690   :  { %2029 = vadd.xlane.f32.xlu1 %v2028_v41 }
 0x692   :  { %v2042_v26 = vpop.permute.xlu1 %2041 }
 0x693   :  { %v2044_v42 = vsel %vm2027_vm3, %v2042_v26, 0.0 }
 0x694   :  { %2045 = vadd.xlane.f32.xlu0 %v2044_v42 }
 0x719   :  { %v2030_v45 = vpop.xlane.xlu1 %2029 }
 0x71a   :  { %2386 = vlog2.f32 %v2030_v45 }
 0x71d   :  { %v2046_v48 = vpop.xlane.xlu0 %2045 }
 0x727   :  { %v2387_v8 = vpop.eup %2386 }
 0x728   :  { %v2032_v46 = vmul.f32 0.6931472, %v2387_v8 }
 0x72a   :  { %v2033_v47 = vadd.f32 %v2032_v46, %v2019_v37 }
 0x72c   :  { %v2047_v49 = vsub.f32 %v2033_v47, %v2046_v48 }
 0x72e   :  { %v2049_v52 = vsel %vm2048_vm4, %v2047_v49, %v2011_v36 }
 0x72f   :  { %2050 = vst [vmem:[%s3231_s11] sm:$0xf] %v2049_v52 }

</bundles_post_ra>
